<compile_context>
chip_gen: v5e
topology: v5e:2x2
jax: 0.10.0
libtpu: 0.0.40
codegen_flags: <defaults>
</compile_context>

<pallas_src>
import jax
import jax.numpy as jnp
from jax.experimental import pallas as pl
from jax.experimental.pallas import tpu as pltpu

KH = KW = 3          # kernel_size=3
PAD = 1              # padding=1
BN_EPS = 1e-5        # nn.BatchNorm2d default eps
LANE = 128           # TPU lane width


def _round_up(x, m):
    return (x + m - 1) // m * m


def conv_stats_kernel(xp_ref, w_ref, y_ref, stats_ref, col_ref):
    """Per-image 3x3 conv as one padded MXU matmul + partial BN stats.

    xp_ref   : (1, H+2, W+2, Cin)  zero-padded NHWC input block (one image)
    w_ref    : (K_PAD, C_PAD)      folded conv weights, zero padded
    y_ref    : (H*W, C_PAD)        conv output rows for this image (lane dense)
    stats_ref: (1, 2, C_PAD)       per-image [sum, sum-of-squares] per channel
    col_ref  : (H*W, K_PAD)        VMEM scratch: im2col LHS tile
    """
    _, Hp, Wp, Cin = xp_ref.shape
    H, W = Hp - 2 * PAD, Wp - 2 * PAD
    K = KH * KW * Cin
    K_PAD = col_ref.shape[1]

    # Zero only the padded tail columns of the im2col scratch.  Done every grid
    # step so it stays correct however the "parallel" axis is sharded.
    if K_PAD > K:
        col_ref[:, K:] = jnp.zeros((H * W, K_PAD - K), jnp.float32)

    # Build the im2col LHS once: column block t = dy*KW + dx holds the Cin
    # input channels of tap (dy, dx).  One write per tap replaces the previous
    # 9 separate (rows, Cin) x (Cin, Cout) dots + 8 accumulator adds.
    for dy in range(KH):
        for dx in range(KW):
            t = dy * KW + dx
            col_ref[:, t * Cin:(t + 1) * Cin] = (
                xp_ref[0, dy:dy + H, dx:dx + W, :].reshape(H * W, Cin))

    # Single lane-dense MXU matmul (K and N padded to 128), f32 accumulation.
    y = jnp.dot(col_ref[...], w_ref[...], preferred_element_type=jnp.float32)
    y_ref[...] = y

    # Partial batch-norm statistics for this tile (reduced in the wrapper).
    s1 = jnp.sum(y, axis=0, keepdims=True)        # (1, C_PAD)
    s2 = jnp.sum(y * y, axis=0, keepdims=True)    # (1, C_PAD)
    stats_ref[...] = jnp.concatenate([s1, s2], axis=0)[None]


def bn_relu_kernel(y_ref, ab_ref, o_ref):
    """Fused BatchNorm scale/shift + ReLU on a lane-dense row tile.

    y_ref : (TILE, C_PAD) conv output rows
    ab_ref: (2, C_PAD)    row 0 = scale (inv_std), row 1 = shift (-mean*inv_std)
    o_ref : (TILE, C_PAD)
    """
    scale = ab_ref[0:1, :]
    shift = ab_ref[1:2, :]
    o_ref[...] = jnp.maximum(y_ref[...] * scale + shift, 0.0)


def cbr2d_forward(x_nchw, weight, bias=None):
    """x_nchw: (N, Cin, H, W); weight: (Cout, Cin, 3, 3); bias: (Cout,) or None.

    The conv bias is intentionally unused: under training-mode BatchNorm the
    per-channel mean subtraction cancels any per-channel constant offset.
    """
    del bias  # mathematically dead under batch-norm with batch statistics
    N, Cin, H, W = x_nchw.shape
    Cout = weight.shape[0]
    K = KH * KW * Cin
    K_PAD = _round_up(K, LANE)
    C_PAD = _round_up(Cout, LANE)
    rows = N * H * W

    # TODO(synk): callers supplying NHWC (pre-padded) activations would remove
    # this transpose + pad glue (each is a full HBM round trip in XLA).
    x_nhwc = jnp.transpose(x_nchw, (0, 2, 3, 1)).astype(jnp.float32)
    x_pad = jnp.pad(x_nhwc, ((0, 0), (PAD, PAD), (PAD, PAD), (0, 0)))

    # Fold (Cout, Cin, 3, 3) -> (9*Cin, Cout) and zero-pad to lane/MXU sizes.
    # Row order (dy*KW + dx)*Cin + c matches the im2col columns in the kernel.
    w_flat = jnp.transpose(weight, (2, 3, 1, 0)).astype(jnp.float32).reshape(K, Cout)
    w_pad = jnp.zeros((K_PAD, C_PAD), jnp.float32).at[:K, :Cout].set(w_flat)

    # ---- pass 1: conv (one image per grid step) + partial BN stats ----------
    y_conv, part_stats = pl.pallas_call(
        conv_stats_kernel,
        out_shape=(jax.ShapeDtypeStruct((rows, C_PAD), jnp.float32),
                   jax.ShapeDtypeStruct((N, 2, C_PAD), jnp.float32)),
        grid_spec=pltpu.PrefetchScalarGridSpec(
            num_scalar_prefetch=0,
            grid=(N,),
            in_specs=[
                pl.BlockSpec((1, H + 2 * PAD, W + 2 * PAD, Cin),
                             lambda i: (i, 0, 0, 0)),
                pl.BlockSpec((K_PAD, C_PAD), lambda i: (0, 0)),
            ],
            out_specs=[
                pl.BlockSpec((H * W, C_PAD), lambda i: (i, 0)),
                pl.BlockSpec((1, 2, C_PAD), lambda i: (i, 0, 0)),
            ],
            scratch_shapes=[pltpu.VMEM((H * W, K_PAD), jnp.float32)]),
        compiler_params=pltpu.CompilerParams(
            dimension_semantics=("parallel",)),
    )(x_pad, w_pad)

    # ---- finalize global BN statistics (tiny (N,2,C_PAD) f32 reduction) -----
    sums = jnp.sum(part_stats, axis=0)                     # (2, C_PAD)
    mean = sums[0] / rows
    var = sums[1] / rows - mean * mean                     # E[y^2] - E[y]^2
    inv_std = jax.lax.rsqrt(var + BN_EPS)
    # Freshly-initialized BatchNorm2d => gamma=1, beta=0.
    ab = jnp.stack([inv_std, -mean * inv_std], axis=0)     # (2, C_PAD)

    # ---- pass 2: fused normalize + ReLU on lane-dense row tiles --------------
    tile_rows = H * W                                      # divides rows exactly
    out_flat = pl.pallas_call(
        bn_relu_kernel,
        out_shape=jax.ShapeDtypeStruct((rows, C_PAD), jnp.float32),
        grid_spec=pltpu.PrefetchScalarGridSpec(
            num_scalar_prefetch=0,
            grid=(rows // tile_rows,),
            in_specs=[
                pl.BlockSpec((tile_rows, C_PAD), lambda i: (i, 0)),
                pl.BlockSpec((2, C_PAD), lambda i: (0, 0)),
            ],
            out_specs=pl.BlockSpec((tile_rows, C_PAD), lambda i: (i, 0))),
        compiler_params=pltpu.CompilerParams(
            dimension_semantics=("parallel",)),
    )(y_conv, ab)

    # Slice away channel padding, back to NCHW.
    out_nhwc = out_flat[:, :Cout].reshape(N, H, W, Cout)
    return jnp.transpose(out_nhwc, (0, 3, 1, 2))


def cbr2d_reference(x_nchw, weight, bias):
    """Pure-JAX reference matching PyTorch CBR2d forward (training-mode BN).

    Keeps the conv bias to demonstrate that dropping it in the kernel is
    correctness-preserving (BatchNorm cancels it).
    """
    y = jax.lax.conv_general_dilated(
        x_nchw.astype(jnp.float32), weight.astype(jnp.float32),
        window_strides=(1, 1), padding=((PAD, PAD), (PAD, PAD)),
        dimension_numbers=("NCHW", "OIHW", "NCHW"))
    y = y + bias.reshape(1, -1, 1, 1)
    mean = jnp.mean(y, axis=(0, 2, 3), keepdims=True)
    var = jnp.mean((y - mean) ** 2, axis=(0, 2, 3), keepdims=True)
    y = (y - mean) * jax.lax.rsqrt(var + BN_EPS)
    return jnp.maximum(y, 0.0)


if __name__ == "__main__":
    # Small shapes consistent with the module: batch=2, in_ch=4, out_ch=8, 16x16.
    N, CIN, COUT, H, W = 2, 4, 8, 16, 16

    key = jax.random.PRNGKey(0)
    kx, kw, kb = jax.random.split(key, 3)

    x = jax.random.normal(kx, (N, CIN, H, W), dtype=jnp.float32)
    fan_in = CIN * KH * KW
    weight = jax.random.uniform(kw, (COUT, CIN, KH, KW), jnp.float32,
                                minval=-1.0, maxval=1.0) / jnp.sqrt(fan_in)
    bias = jax.random.uniform(kb, (COUT,), jnp.float32,
                              minval=-1.0, maxval=1.0) / jnp.sqrt(fan_in)

    out = jax.block_until_ready(cbr2d_forward(x, weight, bias))
    ref = jax.block_until_ready(cbr2d_reference(x, weight, bias))

    assert out.shape == (N, COUT, H, W)
    err = jnp.max(jnp.abs(out - ref))
    assert jnp.allclose(out, ref, rtol=1e-4, atol=1e-4), f"max abs err {err}"

    print("KERNEL_OK")
</pallas_src>

<mosaic_0001>
module attributes {stable_mosaic.version = 11 : i64} {
  func.func @conv_stats_kernel(%arg0: i32, %arg1: memref<1x18x18x4xf32, #tpu.memory_space<vmem>>, %arg2: memref<128x128xf32, #tpu.memory_space<vmem>>, %arg3: memref<256x128xf32, #tpu.memory_space<vmem>>, %arg4: memref<1x2x128xf32, #tpu.memory_space<vmem>>, %arg5: memref<256x128xf32, #tpu.memory_space<vmem>>) attributes {dimension_semantics = [#tpu.dimension_semantics<parallel>], iteration_bounds = array<i64: 2>, scalar_prefetch = 0 : i64, scratch_operands = 1 : i64, tpu.core_type = #tpu.core_type<tc>, window_params = [{transform_indices = @transform_0, window_bounds = array<i64: 1, 18, 18, 4>}, {pipeline_mode = #tpu.pipeline_mode<synchronous>, transform_indices = @transform_1, window_bounds = array<i64: 128, 128>}, {transform_indices = @transform_2, window_bounds = array<i64: 256, 128>}, {transform_indices = @transform_3, window_bounds = array<i64: 1, 2, 128>}]} {
    %cst = arith.constant 0.000000e+00 : f32
    %0 = vector.broadcast %cst : f32 to vector<256x92xf32>
    %c0 = arith.constant 0 : index
    %c36 = arith.constant 36 : index
    %1 = vector.load %arg5[%c0, %c36] : memref<256x128xf32, #tpu.memory_space<vmem>>, vector<256x92xf32>
    tpu.vector_store %arg5[%c0, %c36], %0 {strides = array<i32>} : memref<256x128xf32, #tpu.memory_space<vmem>>, vector<256x92xf32>,
    %c0_0 = arith.constant 0 : index
    %c0_1 = arith.constant 0 : index
    %c0_2 = arith.constant 0 : index
    %c0_3 = arith.constant 0 : index
    %2 = vector.load %arg1[%c0_0, %c0_1, %c0_2, %c0_3] : memref<1x18x18x4xf32, #tpu.memory_space<vmem>>, vector<1x16x16x4xf32>
    %3 = vector.shape_cast %2 : vector<1x16x16x4xf32> to vector<16x16x4xf32>
    %4 = vector.shape_cast %3 : vector<16x16x4xf32> to vector<256x4xf32>
    %c0_4 = arith.constant 0 : index
    %c0_5 = arith.constant 0 : index
    %5 = vector.load %arg5[%c0_4, %c0_5] : memref<256x128xf32, #tpu.memory_space<vmem>>, vector<256x4xf32>
    tpu.vector_store %arg5[%c0_4, %c0_5], %4 {strides = array<i32>} : memref<256x128xf32, #tpu.memory_space<vmem>>, vector<256x4xf32>,
    %c0_6 = arith.constant 0 : index
    %c0_7 = arith.constant 0 : index
    %c1 = arith.constant 1 : index
    %c0_8 = arith.constant 0 : index
    %6 = vector.load %arg1[%c0_6, %c0_7, %c1, %c0_8] : memref<1x18x18x4xf32, #tpu.memory_space<vmem>>, vector<1x16x16x4xf32>
    %7 = vector.shape_cast %6 : vector<1x16x16x4xf32> to vector<16x16x4xf32>
    %8 = vector.shape_cast %7 : vector<16x16x4xf32> to vector<256x4xf32>
    %c0_9 = arith.constant 0 : index
    %c4 = arith.constant 4 : index
    %9 = vector.load %arg5[%c0_9, %c4] : memref<256x128xf32, #tpu.memory_space<vmem>>, vector<256x4xf32>
    tpu.vector_store %arg5[%c0_9, %c4], %8 {strides = array<i32>} : memref<256x128xf32, #tpu.memory_space<vmem>>, vector<256x4xf32>,
    %c0_10 = arith.constant 0 : index
    %c0_11 = arith.constant 0 : index
    %c2 = arith.constant 2 : index
    %c0_12 = arith.constant 0 : index
    %10 = vector.load %arg1[%c0_10, %c0_11, %c2, %c0_12] : memref<1x18x18x4xf32, #tpu.memory_space<vmem>>, vector<1x16x16x4xf32>
    %11 = vector.shape_cast %10 : vector<1x16x16x4xf32> to vector<16x16x4xf32>
    %12 = vector.shape_cast %11 : vector<16x16x4xf32> to vector<256x4xf32>
    %c0_13 = arith.constant 0 : index
    %c8 = arith.constant 8 : index
    %13 = vector.load %arg5[%c0_13, %c8] : memref<256x128xf32, #tpu.memory_space<vmem>>, vector<256x4xf32>
    tpu.vector_store %arg5[%c0_13, %c8], %12 {strides = array<i32>} : memref<256x128xf32, #tpu.memory_space<vmem>>, vector<256x4xf32>,
    %c0_14 = arith.constant 0 : index
    %c1_15 = arith.constant 1 : index
    %c0_16 = arith.constant 0 : index
    %c0_17 = arith.constant 0 : index
    %14 = vector.load %arg1[%c0_14, %c1_15, %c0_16, %c0_17] : memref<1x18x18x4xf32, #tpu.memory_space<vmem>>, vector<1x16x16x4xf32>
    %15 = vector.shape_cast %14 : vector<1x16x16x4xf32> to vector<16x16x4xf32>
    %16 = vector.shape_cast %15 : vector<16x16x4xf32> to vector<256x4xf32>
    %c0_18 = arith.constant 0 : index
    %c12 = arith.constant 12 : index
    %17 = vector.load %arg5[%c0_18, %c12] : memref<256x128xf32, #tpu.memory_space<vmem>>, vector<256x4xf32>
    tpu.vector_store %arg5[%c0_18, %c12], %16 {strides = array<i32>} : memref<256x128xf32, #tpu.memory_space<vmem>>, vector<256x4xf32>,
    %c0_19 = arith.constant 0 : index
    %c1_20 = arith.constant 1 : index
    %c1_21 = arith.constant 1 : index
    %c0_22 = arith.constant 0 : index
    %18 = vector.load %arg1[%c0_19, %c1_20, %c1_21, %c0_22] : memref<1x18x18x4xf32, #tpu.memory_space<vmem>>, vector<1x16x16x4xf32>
    %19 = vector.shape_cast %18 : vector<1x16x16x4xf32> to vector<16x16x4xf32>
    %20 = vector.shape_cast %19 : vector<16x16x4xf32> to vector<256x4xf32>
    %c0_23 = arith.constant 0 : index
    %c16 = arith.constant 16 : index
    %21 = vector.load %arg5[%c0_23, %c16] : memref<256x128xf32, #tpu.memory_space<vmem>>, vector<256x4xf32>
    tpu.vector_store %arg5[%c0_23, %c16], %20 {strides = array<i32>} : memref<256x128xf32, #tpu.memory_space<vmem>>, vector<256x4xf32>,
    %c0_24 = arith.constant 0 : index
    %c1_25 = arith.constant 1 : index
    %c2_26 = arith.constant 2 : index
    %c0_27 = arith.constant 0 : index
    %22 = vector.load %arg1[%c0_24, %c1_25, %c2_26, %c0_27] : memref<1x18x18x4xf32, #tpu.memory_space<vmem>>, vector<1x16x16x4xf32>
    %23 = vector.shape_cast %22 : vector<1x16x16x4xf32> to vector<16x16x4xf32>
    %24 = vector.shape_cast %23 : vector<16x16x4xf32> to vector<256x4xf32>
    %c0_28 = arith.constant 0 : index
    %c20 = arith.constant 20 : index
    %25 = vector.load %arg5[%c0_28, %c20] : memref<256x128xf32, #tpu.memory_space<vmem>>, vector<256x4xf32>
    tpu.vector_store %arg5[%c0_28, %c20], %24 {strides = array<i32>} : memref<256x128xf32, #tpu.memory_space<vmem>>, vector<256x4xf32>,
    %c0_29 = arith.constant 0 : index
    %c2_30 = arith.constant 2 : index
    %c0_31 = arith.constant 0 : index
    %c0_32 = arith.constant 0 : index
    %26 = vector.load %arg1[%c0_29, %c2_30, %c0_31, %c0_32] : memref<1x18x18x4xf32, #tpu.memory_space<vmem>>, vector<1x16x16x4xf32>
    %27 = vector.shape_cast %26 : vector<1x16x16x4xf32> to vector<16x16x4xf32>
    %28 = vector.shape_cast %27 : vector<16x16x4xf32> to vector<256x4xf32>
    %c0_33 = arith.constant 0 : index
    %c24 = arith.constant 24 : index
    %29 = vector.load %arg5[%c0_33, %c24] : memref<256x128xf32, #tpu.memory_space<vmem>>, vector<256x4xf32>
    tpu.vector_store %arg5[%c0_33, %c24], %28 {strides = array<i32>} : memref<256x128xf32, #tpu.memory_space<vmem>>, vector<256x4xf32>,
    %c0_34 = arith.constant 0 : index
    %c2_35 = arith.constant 2 : index
    %c1_36 = arith.constant 1 : index
    %c0_37 = arith.constant 0 : index
    %30 = vector.load %arg1[%c0_34, %c2_35, %c1_36, %c0_37] : memref<1x18x18x4xf32, #tpu.memory_space<vmem>>, vector<1x16x16x4xf32>
    %31 = vector.shape_cast %30 : vector<1x16x16x4xf32> to vector<16x16x4xf32>
    %32 = vector.shape_cast %31 : vector<16x16x4xf32> to vector<256x4xf32>
    %c0_38 = arith.constant 0 : index
    %c28 = arith.constant 28 : index
    %33 = vector.load %arg5[%c0_38, %c28] : memref<256x128xf32, #tpu.memory_space<vmem>>, vector<256x4xf32>
    tpu.vector_store %arg5[%c0_38, %c28], %32 {strides = array<i32>} : memref<256x128xf32, #tpu.memory_space<vmem>>, vector<256x4xf32>,
    %c0_39 = arith.constant 0 : index
    %c2_40 = arith.constant 2 : index
    %c2_41 = arith.constant 2 : index
    %c0_42 = arith.constant 0 : index
    %34 = vector.load %arg1[%c0_39, %c2_40, %c2_41, %c0_42] : memref<1x18x18x4xf32, #tpu.memory_space<vmem>>, vector<1x16x16x4xf32>
    %35 = vector.shape_cast %34 : vector<1x16x16x4xf32> to vector<16x16x4xf32>
    %36 = vector.shape_cast %35 : vector<16x16x4xf32> to vector<256x4xf32>
    %c0_43 = arith.constant 0 : index
    %c32 = arith.constant 32 : index
    %37 = vector.load %arg5[%c0_43, %c32] : memref<256x128xf32, #tpu.memory_space<vmem>>, vector<256x4xf32>
    tpu.vector_store %arg5[%c0_43, %c32], %36 {strides = array<i32>} : memref<256x128xf32, #tpu.memory_space<vmem>>, vector<256x4xf32>,
    %c0_44 = arith.constant 0 : index
    %c0_45 = arith.constant 0 : index
    %38 = vector.load %arg5[%c0_44, %c0_45] : memref<256x128xf32, #tpu.memory_space<vmem>>, vector<256x128xf32>
    %c0_46 = arith.constant 0 : index
    %c0_47 = arith.constant 0 : index
    %39 = vector.load %arg2[%c0_46, %c0_47] : memref<128x128xf32, #tpu.memory_space<vmem>>, vector<128x128xf32>
    %cst_48 = arith.constant dense<0.000000e+00> : vector<256x128xf32>
    %40 = tpu.matmul %38, %39, %cst_48 {dimension_numbers = #tpu.dot_dimension_numbers<[1], [0], [0], [1], [0, 0, 1, 1], [], []>} : vector<256x128xf32>, vector<128x128xf32>, vector<256x128xf32> -> vector<256x128xf32>
    %c0_49 = arith.constant 0 : index
    %c0_50 = arith.constant 0 : index
    %41 = vector.load %arg3[%c0_49, %c0_50] : memref<256x128xf32, #tpu.memory_space<vmem>>, vector<256x128xf32>
    tpu.vector_store %arg3[%c0_49, %c0_50], %40 {strides = array<i32>} : memref<256x128xf32, #tpu.memory_space<vmem>>, vector<256x128xf32>,
    %cst_51 = arith.constant dense<0.000000e+00> : vector<128xf32>
    %42 = vector.multi_reduction <add>, %40, %cst_51 [0] : vector<256x128xf32> to vector<128xf32>
    %43 = vector.shape_cast %42 : vector<128xf32> to vector<1x128xf32>
    %44 = arith.mulf %40, %40 : vector<256x128xf32>
    %cst_52 = arith.constant dense<0.000000e+00> : vector<128xf32>
    %45 = vector.multi_reduction <add>, %44, %cst_52 [0] : vector<256x128xf32> to vector<128xf32>
    %46 = vector.shape_cast %45 : vector<128xf32> to vector<1x128xf32>
    %47 = tpu.concatenate %43, %46 in 0 : vector<1x128xf32>, vector<1x128xf32> -> vector<2x128xf32>
    %48 = vector.shape_cast %47 : vector<2x128xf32> to vector<1x2x128xf32>
    %c0_53 = arith.constant 0 : index
    %c0_54 = arith.constant 0 : index
    %c0_55 = arith.constant 0 : index
    %49 = vector.load %arg4[%c0_53, %c0_54, %c0_55] : memref<1x2x128xf32, #tpu.memory_space<vmem>>, vector<1x2x128xf32>
    tpu.vector_store %arg4[%c0_53, %c0_54, %c0_55], %48 {strides = array<i32>} : memref<1x2x128xf32, #tpu.memory_space<vmem>>, vector<1x2x128xf32>,
    return
  }
  func.func @transform_0(%arg0: i32) -> (i32, i32, i32, i32) {
    %c0_i32 = arith.constant 0 : i32
    %c0_i32_0 = arith.constant 0 : i32
    %c0_i32_1 = arith.constant 0 : i32
    %c0_i32_2 = arith.constant 0 : i32
    return %arg0, %c0_i32, %c0_i32_0, %c0_i32_1 : i32, i32, i32, i32
  }
  func.func @transform_1(%arg0: i32) -> (i32, i32) {
    %c0_i32 = arith.constant 0 : i32
    %c0_i32_0 = arith.constant 0 : i32
    %c0_i32_1 = arith.constant 0 : i32
    return %c0_i32, %c0_i32_0 : i32, i32
  }
  func.func @transform_2(%arg0: i32) -> (i32, i32) {
    %c0_i32 = arith.constant 0 : i32
    %c0_i32_0 = arith.constant 0 : i32
    return %arg0, %c0_i32 : i32, i32
  }
  func.func @transform_3(%arg0: i32) -> (i32, i32, i32) {
    %c0_i32 = arith.constant 0 : i32
    %c0_i32_0 = arith.constant 0 : i32
    %c0_i32_1 = arith.constant 0 : i32
    return %arg0, %c0_i32, %c0_i32_0 : i32, i32, i32
  }
}

</mosaic_0001>

<bundles_post_ra>
// kernel: tpu_custom_call.1
= control target key start
LH: loop header
LB: loop body
LE: loop exit
PB: predicated region body
PF: predicated region fallthrough
CT: control target
= control target key end

     0   :  { %9 = vsyncpa [#allocation4], 0  ;;  %s4113_s0 = inlined_call_operand.vmem [shape: f32[2,18,18,4], index: 0, kind: input, shape index: {}]   ;;  %s4114_s1 = inlined_call_operand.vmem [shape: f32[128,128], index: 1, kind: input, shape index: {}]   ;;  %s4115_s2 = inlined_call_operand.hbm [shape: f32[512,128], index: 2, kind: output, shape index: {0}]   ;;  %s4116_s3 = inlined_call_operand.hbm [shape: f32[2,2,128], index: 3, kind: output, shape index: {1}]  }
   0x1   :  { %11 = vsyncpa [#allocation4 + $0x1], 0 }
   0x2   :  { %12 = vsyncpa [#allocation6], 0 }
   0x3   :  { %14 = vsyncpa [#allocation6 + $0x1], 0  ;;  %s2693_s12 = smov 0   ;;  %s2695_s13 = smov 0  }
   0x4   :  { %s2697_s14 = smov 0   ;;  %s2699_s15 = smov 0  }
   0x5 LB: > { %s2714_s16 = sadd.s32 4294967295, %s2661_s15   ;;  %s2257_s17 = sadd.s32 4294967294, %s2661_s15   ;;  %s2661_s15 = sphi %s2699_s15, %s4209_s15   ;;  %s2657_s14 = sphi %s2697_s14, %s4208_s14   ;;  %s2653_s13 = sphi %s2695_s13, %s4207_s13   ;;  %s2649_s12 = sphi %s2693_s12, %s4206_s12  }
   0x6   : > { %s2718_s18 = sadd.s32 1, %s2661_s15   ;;  %s74_s19 = sadd.s32 1, %s2657_s14 }
   0x7   : > { %s71_s20 = ssub.s32 %s2661_s15, %s2718_s18  ;;  %p84_p0 = scmp.ne.s32.totalorder %s2657_s14, %s2653_s13 }
   0x8   : > { %p72_p1 = scmp.eq.s32.totalorder %s71_s20, 0  ;;  %p85_p2 = scmp.eq.s32.totalorder %s2714_s16, 1 }
   0x9   : > { %p90_p3 = scmp.ne.s32.totalorder %s2653_s13, %s2649_s12  ;;  %p91_p4 = scmp.eq.s32.totalorder %s2257_s17, 1 }
   0xa   : > { %s2729_s21 = scalar_select %p72_p1, %s2657_s14, %s74_s19  }
   0xb   : > { %p2731_p5 = por %p85_p2, %p84_p0  ;;  %p2735_p6 = por %p91_p4, %p90_p3 }
   0xc   : > { %p2260_p7 = scmp.ge.s32.totalorder %s2661_s15, 1  ;;  %p146_p8 = scmp.lt.s32.totalorder %s2661_s15, 3 }
   0xe   : > { %p147_p9 = pnand %p2260_p7, %p146_p8 }
  0x10   : > { %150 = sbr.rel (%p147_p9) target bundleno = 985 (0x3d9), region = 28 }
  0x15   : > { %p175_p10 = scmp.lt.s32.totalorder %s2714_s16, 1  ;;  %s2663_s29 = smov 4   ;;  %vm181_vm0 = vcmask 1047840   ;;  %v2664_v31 = vmov 0.0   ;;  %vm246_vm1 = vcmask 31744   ;;  %vm439_vm2 = vcmask 64544  }
  0x16   : > { %186 = vst.msk [vmem:[#allocation2 + $0x20] sm:$0xff] %vm181_vm0, %v2664_v31  ;;  %s2665_s30 = smov 8   ;;  %s2666_s4 = smov 12   ;;  %vm632_vm3 = vcmask 97344   ;;  %vm826_vm4 = vcmask 130144   ;;  %vm1019_vm5 = vcmask 162944  }
  0x17   : > { %s176_s24 = scalar_select %p175_p10, %s2714_s16, 1  ;;  %182 = vst.msk [vmem:[#allocation2] sm:$0xff] %vm181_vm0, %v2664_v31  ;;  %vm1212_vm6 = vcmask 195744   ;;  %vm1406_vm7 = vcmask 228544   ;;  %vm1599_vm8 = vcmask 261344   ;;  %vm1792_vm9 = vcmask 294144  }
  0x18   : > { %183 = vst.msk [vmem:[#allocation2 + $0x8] sm:$0xff] %vm181_vm0, %v2664_v31  ;;  %s2667_s5 = smov 16   ;;  %s2668_s6 = smov 20  }
  0x19   : > { %s2512_s25 = smul.u32 432, %s176_s24  ;;  %184 = vst.msk [vmem:[#allocation2 + $0x10] sm:$0xff] %vm181_vm0, %v2664_v31  ;;  %s2669_s7 = smov 24  }
  0x1a   : > { %185 = vst.msk [vmem:[#allocation2 + $0x18] sm:$0xff] %vm181_vm0, %v2664_v31  ;;  %s2670_s8 = smov 28   ;;  %s2671_s9 = smov 32  }
  0x1b   : > { %s2746_s28 = scalar_lea.vmem %s4113_s0, %s2512_s25  ;;  %187 = vst.msk [vmem:[#allocation2 + $0x28] sm:$0xff] %vm181_vm0, %v2664_v31  ;;  %s3917_s27 = sand.u32 1, %s2653_s13  }
  0x1c   : > { %v2749_v0 = vld [vmem:[%s2746_s28 + $0x19] sm:$0xff]  ;;  %v279_v1 = vld [vmem:[%s2746_s28 + $0x1] sm:$0xff]  ;;  %v2756_v2 = vld [vmem:[%s2746_s28 + $0x31] sm:$0xff]  ;;  %188 = vst.msk [vmem:[#allocation2 + $0x30] sm:$0xff] %vm181_vm0, %v2664_v31  ;;  %s2128_s10 = scalar_lea.sflag [#allocation4], %s3917_s27  ;;  %s2587_s24 = scalar_lea.hbm %s4115_s2, 512 }
  0x1d   : > { %347 = vrot.lane.b32.xlu1 %v2749_v0, %s2663_s29  ;;  %343 = vrot.lane.b32.xlu0 %v279_v1, %s2663_s29  ;;  %v2761_v3 = vld [vmem:[%s2746_s28 + $0x21] sm:$0xff]  ;;  %v280_v4 = vld [vmem:[%s2746_s28 + $0x9] sm:$0xff]  ;;  %189 = vst.msk [vmem:[#allocation2 + $0x38] sm:$0xff] %vm181_vm0, %v2664_v31 }
  0x1e   : > { %351 = vrot.lane.b32.xlu2 %v2756_v2, %s2663_s29  ;;  %v2765_v5 = vld [vmem:[%s2746_s28 + $0x39] sm:$0xff]  ;;  %v2773_v6 = vld [vmem:[%s2746_s28 + $0x51] sm:$0xff]  ;;  %v2776_v7 = vld [vmem:[%s2746_s28 + $0x49] sm:$0xff]  ;;  %190 = vst.msk [vmem:[#allocation2 + $0x40] sm:$0xff] %vm181_vm0, %v2664_v31 }
  0x1f   : > { %v2779_v8 = vld [vmem:[%s2746_s28 + $0x61] sm:$0xff]  ;;  %v2788_v9 = vld [vmem:[%s2746_s28 + $0x79] sm:$0xff]  ;;  %v2791_v10 = vld [vmem:[%s2746_s28 + $0x69] sm:$0xff]  ;;  %191 = vst.msk [vmem:[#allocation2 + $0x48] sm:$0xff] %vm181_vm0, %v2664_v31 }
  0x20   : > { %v2794_v11 = vld [vmem:[%s2746_s28 + $0x81] sm:$0xff]  ;;  %v2803_v12 = vld [vmem:[%s2746_s28 + $0x99] sm:$0xff]  ;;  %v2806_v13 = vld [vmem:[%s2746_s28 + $0x91] sm:$0xff]  ;;  %192 = vst.msk [vmem:[#allocation2 + $0x50] sm:$0xff] %vm181_vm0, %v2664_v31 }
  0x21   : > { %v2809_v14 = vld [vmem:[%s2746_s28 + $0xa9] sm:$0xff]  ;;  %v2818_v15 = vld [vmem:[%s2746_s28 + $0xc1] sm:$0xff]  ;;  %v2821_v16 = vld [vmem:[%s2746_s28 + $0xb1] sm:$0xff]  ;;  %193 = vst.msk [vmem:[#allocation2 + $0x58] sm:$0xff] %vm181_vm0, %v2664_v31 }
  0x22   : > { %v2824_v17 = vld [vmem:[%s2746_s28 + $0xc9] sm:$0xff]  ;;  %v2833_v18 = vld [vmem:[%s2746_s28 + $0xe1] sm:$0xff]  ;;  %v2836_v19 = vld [vmem:[%s2746_s28 + $0xd9] sm:$0xff]  ;;  %194 = vst.msk [vmem:[#allocation2 + $0x60] sm:$0xff] %vm181_vm0, %v2664_v31 }
  0x23   : > { %v2839_v20 = vld [vmem:[%s2746_s28 + $0xf1] sm:$0xff]  ;;  %v2848_v21 = vld [vmem:[%s2746_s28 + $0x109] sm:$0xff]  ;;  %v2851_v22 = vld [vmem:[%s2746_s28 + $0xf9] sm:$0xff]  ;;  %195 = vst.msk [vmem:[#allocation2 + $0x68] sm:$0xff] %vm181_vm0, %v2664_v31 }
  0x24   : > { %v2854_v23 = vld [vmem:[%s2746_s28 + $0x111] sm:$0xff]  ;;  %v2863_v24 = vld [vmem:[%s2746_s28 + $0x129] sm:$0xff]  ;;  %v2866_v25 = vld [vmem:[%s2746_s28 + $0x121] sm:$0xff]  ;;  %196 = vst.msk [vmem:[#allocation2 + $0x70] sm:$0xff] %vm181_vm0, %v2664_v31 }
  0x25   : > { %349 = vrot.lane.b32.xlu1 %v2761_v3, %s2663_s29  ;;  %345 = vrot.lane.b32.xlu0 %v280_v4, %s2663_s29  ;;  %v2869_v26 = vld [vmem:[%s2746_s28 + $0x139] sm:$0xff]  ;;  %v2878_v27 = vld [vmem:[%s2746_s28 + $0x151] sm:$0xff]  ;;  %197 = vst.msk [vmem:[#allocation2 + $0x78] sm:$0xff] %vm181_vm0, %v2664_v31 }
  0x26   : > { %353 = vrot.lane.b32.xlu2 %v2765_v5, %s2663_s29  ;;  %v2881_v28 = vld [vmem:[%s2746_s28 + $0x141] sm:$0xff]  ;;  %v2884_v29 = vld [vmem:[%s2746_s28 + $0x159] sm:$0xff]  ;;  %v2891_v30 = vld [vmem:[%s2746_s28 + $0x30] sm:$0xff]  ;;  %198 = vst.msk [vmem:[#allocation2 + $0x80] sm:$0xff] %vm181_vm0, %v2664_v31 }
  0x27   : > { %4148 = vst [vmem:[#allocation9_spill] sm:$0xff] %v2884_v29  ;;  %v2904_v32 = vld [vmem:[%s2746_s28 + $0x171] sm:$0xff]  ;;  %v2907_v33 = vld [vmem:[%s2746_s28 + $0x169] sm:$0xff]  ;;  %v2932_v35 = vld [vmem:[%s2746_s28 + $0x1a] sm:$0xff] }
  0x28   : > { %251 = vst.msk [vmem:[#allocation2 + $0x20] sm:$0xff] %vm246_vm1, %v2891_v30  ;;  %v472_v34 = vld [vmem:[%s2746_s28 + $0x2] sm:$0xff]  ;;  %v473_v36 = vld [vmem:[%s2746_s28 + $0xa] sm:$0xff]  ;;  %v2960_v39 = vld [vmem:[%s2746_s28 + $0x3a] sm:$0xff] }
  0x29   : > { %4149 = vst [vmem:[#allocation10_spill] sm:$0xff] %v2904_v32  ;;  %v2940_v37 = vld [vmem:[%s2746_s28 + $0x22] sm:$0xff]  ;;  %v2963_v40 = vld [vmem:[%s2746_s28 + $0x32] sm:$0xff]  ;;  %v2971_v41 = vld [vmem:[%s2746_s28 + $0x4a] sm:$0xff] }
  0x2a   : > { %4150 = vst [vmem:[#allocation11_spill] sm:$0xff] %v2907_v33  ;;  %v2990_v43 = vld [vmem:[%s2746_s28 + $0x62] sm:$0xff]  ;;  %v2993_v44 = vld [vmem:[%s2746_s28 + $0x52] sm:$0xff]  ;;  %v3002_v45 = vld [vmem:[%s2746_s28 + $0x6a] sm:$0xff] }
  0x2b   : > { %4151 = vst [vmem:[#allocation12_spill] sm:$0xff] %v2932_v35  ;;  %v3011_v46 = vld [vmem:[%s2746_s28 + $0x18] sm:$0xff]  ;;  %v214_v47 = vld [vmem:[%s2746_s28] sm:$0xff]  ;;  %v215_v53 = vld [vmem:[%s2746_s28 + $0x8] sm:$0xff] }
  0x2c   : > { %4152 = vst [vmem:[#allocation13_spill] sm:$0xff] %v2940_v37  ;;  %v3019_v48 = vld [vmem:[%s2746_s28 + $0x38] sm:$0xff]  ;;  %v3027_v49 = vld [vmem:[%s2746_s28 + $0x20] sm:$0xff]  ;;  %v3058_v58 = vld [vmem:[%s2746_s28 + $0x50] sm:$0xff] }
  0x2d   : > { %357 = vrot.lane.b32.xlu1 %v2773_v6, %s2663_s29  ;;  %355 = vrot.lane.b32.xlu0 %v2776_v7, %s2663_s29  ;;  %199 = vst.msk [vmem:[#allocation2 + $0x88] sm:$0xff] %vm181_vm0, %v2664_v31  ;;  %v3030_v51 = vld [vmem:[%s2746_s28 + $0x82] sm:$0xff]  ;;  %v3033_v52 = vld [vmem:[%s2746_s28 + $0x7a] sm:$0xff] }
  0x2e   : > { %359 = vrot.lane.b32.xlu2 %v2779_v8, %s2663_s29  ;;  %200 = vst.msk [vmem:[#allocation2 + $0x90] sm:$0xff] %vm181_vm0, %v2664_v31  ;;  %v3040_v54 = vld [vmem:[%s2746_s28 + $0x60] sm:$0xff]  ;;  %v3045_v55 = vld [vmem:[%s2746_s28 + $0x92] sm:$0xff]  ;;  %v3062_v59 = vld [vmem:[%s2746_s28 + $0x48] sm:$0xff] }
  0x2f   : > { %4153 = vst [vmem:[#allocation14_spill] sm:$0xff] %v2960_v39  ;;  %v3066_v61 = vld [vmem:[%s2746_s28 + $0x80] sm:$0xff]  ;;  %v3069_v62 = vld [vmem:[%s2746_s28 + $0xaa] sm:$0xff]  ;;  %v3079_v1 = vld [vmem:[%s2746_s28 + $0x78] sm:$0xff] }
  0x30   : > { %4154 = vst [vmem:[#allocation15_spill] sm:$0xff] %v2963_v40  ;;  %v3072_v63 = vld [vmem:[%s2746_s28 + $0x9a] sm:$0xff]  ;;  %v3084_v4 = vld [vmem:[%s2746_s28 + $0xb2] sm:$0xff] }
  0x31   : > { %201 = vst.msk [vmem:[#allocation2 + $0x98] sm:$0xff] %vm181_vm0, %v2664_v31 }
  0x32   : > { %202 = vst.msk [vmem:[#allocation2 + $0xa0] sm:$0xff] %vm181_vm0, %v2664_v31 }
  0x33   : > { %4155 = vst [vmem:[#allocation16_spill] sm:$0xff] %v2971_v41 }
  0x34   : > { %203 = vst.msk [vmem:[#allocation2 + $0xa8] sm:$0xff] %vm181_vm0, %v2664_v31 }
  0x35   : > { %363 = vrot.lane.b32.xlu1 %v2788_v9, %s2663_s29  ;;  %361 = vrot.lane.b32.xlu0 %v2791_v10, %s2663_s29  ;;  %204 = vst.msk [vmem:[#allocation2 + $0xb0] sm:$0xff] %vm181_vm0, %v2664_v31 }
  0x36   : > { %365 = vrot.lane.b32.xlu2 %v2794_v11, %s2663_s29  ;;  %205 = vst.msk [vmem:[#allocation2 + $0xb8] sm:$0xff] %vm181_vm0, %v2664_v31 }
  0x37   : > { %206 = vst.msk [vmem:[#allocation2 + $0xc0] sm:$0xff] %vm181_vm0, %v2664_v31 }
  0x38   : > { %207 = vst.msk [vmem:[#allocation2 + $0xc8] sm:$0xff] %vm181_vm0, %v2664_v31 }
  0x39   : > { %4156 = vst [vmem:[#allocation17_spill] sm:$0xff] %v2990_v43 }
  0x3a   : > { %4157 = vst [vmem:[#allocation18_spill] sm:$0xff] %v2993_v44 }
  0x3b   : > { %208 = vst.msk [vmem:[#allocation2 + $0xd0] sm:$0xff] %vm181_vm0, %v2664_v31 }
  0x3c   : > { %209 = vst.msk [vmem:[#allocation2 + $0xd8] sm:$0xff] %vm181_vm0, %v2664_v31 }
  0x3d   : > { %369 = vrot.lane.b32.xlu1 %v2803_v12, %s2663_s29  ;;  %367 = vrot.lane.b32.xlu0 %v2806_v13, %s2663_s29  ;;  %210 = vst.msk [vmem:[#allocation2 + $0xe0] sm:$0xff] %vm181_vm0, %v2664_v31 }
  0x3e   : > { %371 = vrot.lane.b32.xlu2 %v2809_v14, %s2663_s29  ;;  %4158 = vst [vmem:[#allocation19_spill] sm:$0xff] %v3002_v45 }
  0x3f   : > { %211 = vst.msk [vmem:[#allocation2 + $0xe8] sm:$0xff] %vm181_vm0, %v2664_v31 }
  0x40   : > { %212 = vst.msk [vmem:[#allocation2 + $0xf0] sm:$0xff] %vm181_vm0, %v2664_v31 }
  0x41   : > { %213 = vst.msk [vmem:[#allocation2 + $0xf8] sm:$0xff] %vm181_vm0, %v2664_v31  ;;  %v3087_v31 = vld [vmem:[%s2746_s28 + $0x68] sm:$0xff] }
  0x42   : > { %249 = vst.msk [vmem:[#allocation2 + $0x10] sm:$0xff] %vm246_vm1, %v3011_v46 }
  0x43   : > { %247 = vst.msk [vmem:[#allocation2] sm:$0xff] %vm246_vm1, %v214_v47  ;;  %v3106_v47 = vld [vmem:[%s2746_s28 + $0x98] sm:$0xff] }
  0x44   : > { %4159 = vst [vmem:[#allocation20_spill] sm:$0xff] %v3030_v51 }
  0x45   : > { %375 = vrot.lane.b32.xlu1 %v2818_v15, %s2663_s29  ;;  %373 = vrot.lane.b32.xlu0 %v2821_v16, %s2663_s29  ;;  %4160 = vst [vmem:[#allocation21_spill] sm:$0xff] %v3033_v52 }
  0x46   : > { %377 = vrot.lane.b32.xlu2 %v2824_v17, %s2663_s29  ;;  %252 = vst.msk [vmem:[#allocation2 + $0x28] sm:$0xff] %vm246_vm1, %v3019_v48 }
  0x47   : > { %250 = vst.msk [vmem:[#allocation2 + $0x18] sm:$0xff] %vm246_vm1, %v3027_v49 }
  0x48   : > { %4161 = vst [vmem:[#allocation22_spill] sm:$0xff] %v3045_v55 }
  0x49   : > { %248 = vst.msk [vmem:[#allocation2 + $0x8] sm:$0xff] %vm246_vm1, %v215_v53  ;;  %v3112_v53 = vld [vmem:[%s2746_s28 + $0xc2] sm:$0xff] }
  0x4a   : > { %255 = vst.msk [vmem:[#allocation2 + $0x40] sm:$0xff] %vm246_vm1, %v3040_v54 }
  0x4b   : > { %4162 = vst [vmem:[#allocation23_spill] sm:$0xff] %v3069_v62 }
  0x4c   : > { %4163 = vst [vmem:[#allocation24_spill] sm:$0xff] %v3072_v63 }
  0x4d   : > { %381 = vrot.lane.b32.xlu1 %v2833_v18, %s2663_s29  ;;  %379 = vrot.lane.b32.xlu0 %v2836_v19, %s2663_s29  ;;  %254 = vst.msk [vmem:[#allocation2 + $0x38] sm:$0xff] %vm246_vm1, %v3058_v58 }
  0x4e   : > { %383 = vrot.lane.b32.xlu2 %v2839_v20, %s2663_s29  ;;  %253 = vst.msk [vmem:[#allocation2 + $0x30] sm:$0xff] %vm246_vm1, %v3062_v59 }
  0x4f   : > { %258 = vst.msk [vmem:[#allocation2 + $0x58] sm:$0xff] %vm246_vm1, %v3066_v61 }
  0x50   : > { %4164 = vst [vmem:[#allocation25_spill] sm:$0xff] %v3084_v4 }
  0x51   : > { %257 = vst.msk [vmem:[#allocation2 + $0x50] sm:$0xff] %vm246_vm1, %v3079_v1 }
  0x52   : > { %256 = vst.msk [vmem:[#allocation2 + $0x48] sm:$0xff] %vm246_vm1, %v3087_v31 }
  0x53   : > { %4166 = vst [vmem:[#allocation27_spill] sm:$0xff] %v3112_v53 }
  0x54   : > { %260 = vst.msk [vmem:[#allocation2 + $0x68] sm:$0xff] %vm246_vm1, %v3106_v47 }
  0x55   : > { %387 = vrot.lane.b32.xlu1 %v2848_v21, %s2663_s29  ;;  %385 = vrot.lane.b32.xlu0 %v2851_v22, %s2663_s29 }
  0x56   : > { %389 = vrot.lane.b32.xlu2 %v2854_v23, %s2663_s29 }
  0x5d   : > { %393 = vrot.lane.b32.xlu1 %v2863_v24, %s2663_s29  ;;  %391 = vrot.lane.b32.xlu0 %v2866_v25, %s2663_s29 }
  0x5e   : > { %395 = vrot.lane.b32.xlu2 %v2869_v26, %s2663_s29 }
  0x65   : > { %399 = vrot.lane.b32.xlu1 %v2878_v27, %s2663_s29  ;;  %397 = vrot.lane.b32.xlu0 %v2881_v28, %s2663_s29 }
  0x66   : > { %401 = vrot.lane.b32.xlu2 %v2884_v29, %s2663_s29  ;;  %v3286_v29 = vld [vmem:[%s2746_s28 + $0x168] sm:$0xff] }
  0x67   : > { %277 = vst.msk [vmem:[#allocation2 + $0xf0] sm:$0xff] %vm246_vm1, %v3286_v29 }
  0x6d   : > { %405 = vrot.lane.b32.xlu1 %v2904_v32, %s2663_s29  ;;  %403 = vrot.lane.b32.xlu0 %v2907_v33, %s2663_s29  ;;  %v503_v33 = vld [vmem:[%s2746_s28 + $0x172] sm:$0xff]  ;;  %s2261_s29 = sshll.u32 %s3917_s27, 8 }
  0x6e   : > { %536 = vrot.lane.b32.xlu2 %v472_v34, %s2665_s30 }
  0x75   : > { %540 = vrot.lane.b32.xlu1 %v2932_v35, %s2665_s30  ;;  %538 = vrot.lane.b32.xlu0 %v473_v36, %s2665_s30  ;;  %v3264_v35 = vld [vmem:[%s2746_s28 + $0x152] sm:$0xff] }
  0x76   : > { %542 = vrot.lane.b32.xlu2 %v2940_v37, %s2665_s30  ;;  %v3235_v37 = vld [vmem:[%s2746_s28 + $0x158] sm:$0xff] }
  0x77   : > { %276 = vst.msk [vmem:[#allocation2 + $0xe8] sm:$0xff] %vm246_vm1, %v3235_v37 }
  0x78   : > { %v352_v38 = vpop.permute.xlu2 %351 }
  0x79   : > { %444 = vst.msk [vmem:[#allocation2 + $0x20] sm:$0xff] %vm439_vm2, %v352_v38  ;;  %v3101_v38 = vld [vmem:[%s2746_s28 + $0xa8] sm:$0xff] }
  0x7a   : > { %261 = vst.msk [vmem:[#allocation2 + $0x70] sm:$0xff] %vm246_vm1, %v3101_v38 }
  0x7d   : > { %546 = vrot.lane.b32.xlu1 %v2960_v39, %s2665_s30  ;;  %544 = vrot.lane.b32.xlu0 %v2963_v40, %s2665_s30  ;;  %v3228_v39 = vld [vmem:[%s2746_s28 + $0x13a] sm:$0xff] }
  0x7e   : > { %548 = vrot.lane.b32.xlu2 %v2971_v41, %s2665_s30  ;;  %v3221_v41 = vld [vmem:[%s2746_s28 + $0x128] sm:$0xff]  ;;  %4174 = vst [vmem:[#allocation35_spill] sm:$0xff] %v3228_v39 }
  0x7f   : > { %272 = vst.msk [vmem:[#allocation2 + $0xc8] sm:$0xff] %vm246_vm1, %v3221_v41 }
  0x80   : > { %v354_v42 = vpop.permute.xlu2 %353 }
  0x81   : > { %445 = vst.msk [vmem:[#allocation2 + $0x28] sm:$0xff] %vm439_vm2, %v354_v42 }
  0x85   : > { %552 = vrot.lane.b32.xlu1 %v2990_v43, %s2665_s30  ;;  %550 = vrot.lane.b32.xlu0 %v2993_v44, %s2665_s30  ;;  %v3198_v43 = vld [vmem:[%s2746_s28 + $0x10a] sm:$0xff] }
  0x86   : > { %554 = vrot.lane.b32.xlu2 %v3002_v45, %s2665_s30  ;;  %v3192_v45 = vld [vmem:[%s2746_s28 + $0xf8] sm:$0xff]  ;;  %4172 = vst [vmem:[#allocation33_spill] sm:$0xff] %v3198_v43 }
  0x87   : > { %268 = vst.msk [vmem:[#allocation2 + $0xa8] sm:$0xff] %vm246_vm1, %v3192_v45 }
  0x88   : > { %v360_v50 = vpop.permute.xlu2 %359 }
  0x89   : > { %448 = vst.msk [vmem:[#allocation2 + $0x40] sm:$0xff] %vm439_vm2, %v360_v50  ;;  %v3109_v50 = vld [vmem:[%s2746_s28 + $0xca] sm:$0xff] }
  0x8a   : > { %4165 = vst [vmem:[#allocation26_spill] sm:$0xff] %v3109_v50 }
  0x8d   : > { %558 = vrot.lane.b32.xlu1 %v3030_v51, %s2665_s30  ;;  %556 = vrot.lane.b32.xlu0 %v3033_v52, %s2665_s30  ;;  %v3195_v52 = vld [vmem:[%s2746_s28 + $0x112] sm:$0xff] }
  0x8e   : > { %560 = vrot.lane.b32.xlu2 %v3045_v55, %s2665_s30  ;;  %v3155_v55 = vld [vmem:[%s2746_s28 + $0xe2] sm:$0xff]  ;;  %4171 = vst [vmem:[#allocation32_spill] sm:$0xff] %v3195_v52 }
  0x8f   : > { %v348_v56 = vpop.permute.xlu1 %347  ;;  %v344_v57 = vpop.permute.xlu0 %343  ;;  %4169 = vst [vmem:[#allocation30_spill] sm:$0xff] %v3155_v55 }
  0x90   : > { %442 = vst.msk [vmem:[#allocation2 + $0x10] sm:$0xff] %vm439_vm2, %v348_v56  ;;  %v366_v60 = vpop.permute.xlu2 %365  ;;  %v3117_v56 = vld [vmem:[%s2746_s28 + $0x90] sm:$0xff] }
  0x91   : > { %440 = vst.msk [vmem:[#allocation2] sm:$0xff] %vm439_vm2, %v344_v57  ;;  %v3121_v57 = vld [vmem:[%s2746_s28 + $0xc8] sm:$0xff] }
  0x92   : > { %451 = vst.msk [vmem:[#allocation2 + $0x58] sm:$0xff] %vm439_vm2, %v366_v60  ;;  %v3124_v60 = vld [vmem:[%s2746_s28 + $0xda] sm:$0xff] }
  0x93   : > { %4167 = vst [vmem:[#allocation28_spill] sm:$0xff] %v3124_v60 }
  0x94   : > { %259 = vst.msk [vmem:[#allocation2 + $0x60] sm:$0xff] %vm246_vm1, %v3117_v56 }
  0x95   : > { %564 = vrot.lane.b32.xlu1 %v3069_v62, %s2665_s30  ;;  %562 = vrot.lane.b32.xlu0 %v3072_v63, %s2665_s30  ;;  %264 = vst.msk [vmem:[#allocation2 + $0x88] sm:$0xff] %vm246_vm1, %v3121_v57  ;;  %v3152_v62 = vld [vmem:[%s2746_s28 + $0xf2] sm:$0xff]  ;;  %v3167_v63 = vld [vmem:[%s2746_s28 + $0xfa] sm:$0xff] }
  0x96   : > { %566 = vrot.lane.b32.xlu2 %v3084_v4, %s2665_s30  ;;  %4168 = vst [vmem:[#allocation29_spill] sm:$0xff] %v3152_v62 }
  0x97   : > { %v350_v34 = vpop.permute.xlu1 %349  ;;  %v346_v36 = vpop.permute.xlu0 %345  ;;  %4170 = vst [vmem:[#allocation31_spill] sm:$0xff] %v3167_v63 }
  0x98   : > { %443 = vst.msk [vmem:[#allocation2 + $0x18] sm:$0xff] %vm439_vm2, %v350_v34  ;;  %v372_v42 = vpop.permute.xlu2 %371  ;;  %v3129_v34 = vld [vmem:[%s2746_s28 + $0xc0] sm:$0xff] }
  0x99   : > { %441 = vst.msk [vmem:[#allocation2 + $0x8] sm:$0xff] %vm439_vm2, %v346_v36 }
  0x9a   : > { %454 = vst.msk [vmem:[#allocation2 + $0x70] sm:$0xff] %vm439_vm2, %v372_v42 }
  0x9b   : > { %263 = vst.msk [vmem:[#allocation2 + $0x80] sm:$0xff] %vm246_vm1, %v3129_v34 }
  0x9d   : > { %570 = vrot.lane.b32.xlu1 %v3109_v50, %s2665_s30  ;;  %568 = vrot.lane.b32.xlu0 %v3112_v53, %s2665_s30  ;;  %v3145_v50 = vld [vmem:[%s2746_s28 + $0xb0] sm:$0xff] }
  0x9e   : > { %572 = vrot.lane.b32.xlu2 %v3124_v60, %s2665_s30  ;;  %v3149_v53 = vld [vmem:[%s2746_s28 + $0xf0] sm:$0xff]  ;;  %v3159_v60 = vld [vmem:[%s2746_s28 + $0xe0] sm:$0xff]  ;;  %262 = vst.msk [vmem:[#allocation2 + $0x78] sm:$0xff] %vm246_vm1, %v3145_v50 }
  0x9f   : > { %v358_v36 = vpop.permute.xlu1 %357  ;;  %v356_v42 = vpop.permute.xlu0 %355  ;;  %267 = vst.msk [vmem:[#allocation2 + $0xa0] sm:$0xff] %vm246_vm1, %v3149_v53 }
  0xa0   : > { %447 = vst.msk [vmem:[#allocation2 + $0x38] sm:$0xff] %vm439_vm2, %v358_v36  ;;  %v378_v4 = vpop.permute.xlu2 %377  ;;  %v3164_v36 = vld [vmem:[%s2746_s28 + $0xd8] sm:$0xff] }
  0xa1   : > { %446 = vst.msk [vmem:[#allocation2 + $0x30] sm:$0xff] %vm439_vm2, %v356_v42  ;;  %v3172_v42 = vld [vmem:[%s2746_s28 + $0x110] sm:$0xff] }
  0xa2   : > { %457 = vst.msk [vmem:[#allocation2 + $0x88] sm:$0xff] %vm439_vm2, %v378_v4 }
  0xa3   : > { %266 = vst.msk [vmem:[#allocation2 + $0x98] sm:$0xff] %vm246_vm1, %v3159_v60 }
  0xa4   : > { %265 = vst.msk [vmem:[#allocation2 + $0x90] sm:$0xff] %vm246_vm1, %v3164_v36 }
  0xa5   : > { %576 = vrot.lane.b32.xlu1 %v3152_v62, %s2665_s30  ;;  %574 = vrot.lane.b32.xlu0 %v3155_v55, %s2665_s30  ;;  %270 = vst.msk [vmem:[#allocation2 + $0xb8] sm:$0xff] %vm246_vm1, %v3172_v42  ;;  %v3188_v62 = vld [vmem:[%s2746_s28 + $0x108] sm:$0xff] }
  0xa6   : > { %578 = vrot.lane.b32.xlu2 %v3167_v63, %s2665_s30  ;;  %v3202_v63 = vld [vmem:[%s2746_s28 + $0x138] sm:$0xff]  ;;  %269 = vst.msk [vmem:[#allocation2 + $0xb0] sm:$0xff] %vm246_vm1, %v3188_v62 }
  0xa7   : > { %v364_v4 = vpop.permute.xlu1 %363  ;;  %v362_v51 = vpop.permute.xlu0 %361  ;;  %273 = vst.msk [vmem:[#allocation2 + $0xd0] sm:$0xff] %vm246_vm1, %v3202_v63 }
  0xa8   : > { %450 = vst.msk [vmem:[#allocation2 + $0x50] sm:$0xff] %vm439_vm2, %v364_v4  ;;  %v384_v55 = vpop.permute.xlu2 %383  ;;  %v3207_v4 = vld [vmem:[%s2746_s28 + $0x122] sm:$0xff] }
  0xa9   : > { %449 = vst.msk [vmem:[#allocation2 + $0x48] sm:$0xff] %vm439_vm2, %v362_v51 }
  0xaa   : > { %460 = vst.msk [vmem:[#allocation2 + $0xa0] sm:$0xff] %vm439_vm2, %v384_v55 }
  0xab   : > { %4173 = vst [vmem:[#allocation34_spill] sm:$0xff] %v3207_v4 }
  0xad   : > { %582 = vrot.lane.b32.xlu1 %v3195_v52, %s2665_s30  ;;  %580 = vrot.lane.b32.xlu0 %v3198_v43, %s2665_s30  ;;  %v3225_v52 = vld [vmem:[%s2746_s28 + $0x120] sm:$0xff]  ;;  %v3231_v43 = vld [vmem:[%s2746_s28 + $0x12a] sm:$0xff] }
  0xae   : > { %584 = vrot.lane.b32.xlu2 %v3207_v4, %s2665_s30  ;;  %4175 = vst [vmem:[#allocation36_spill] sm:$0xff] %v3231_v43  ;;  %v3254_v4 = vld [vmem:[%s2746_s28 + $0x150] sm:$0xff] }
  0xaf   : > { %v370_v51 = vpop.permute.xlu1 %369  ;;  %v368_v55 = vpop.permute.xlu0 %367  ;;  %271 = vst.msk [vmem:[#allocation2 + $0xc0] sm:$0xff] %vm246_vm1, %v3225_v52 }
  0xb0   : > { %453 = vst.msk [vmem:[#allocation2 + $0x68] sm:$0xff] %vm439_vm2, %v370_v51  ;;  %v390_v44 = vpop.permute.xlu2 %389  ;;  %v3240_v51 = vld [vmem:[%s2746_s28 + $0x142] sm:$0xff] }
  0xb1   : > { %452 = vst.msk [vmem:[#allocation2 + $0x60] sm:$0xff] %vm439_vm2, %v368_v55 }
  0xb2   : > { %463 = vst.msk [vmem:[#allocation2 + $0xb8] sm:$0xff] %vm439_vm2, %v390_v44 }
  0xb3   : > { %4176 = vst [vmem:[#allocation37_spill] sm:$0xff] %v3240_v51 }
  0xb4   : > { %275 = vst.msk [vmem:[#allocation2 + $0xe0] sm:$0xff] %vm246_vm1, %v3254_v4 }
  0xb5   : > { %588 = vrot.lane.b32.xlu1 %v3228_v39, %s2665_s30  ;;  %586 = vrot.lane.b32.xlu0 %v3231_v43, %s2665_s30  ;;  %v3258_v39 = vld [vmem:[%s2746_s28 + $0x140] sm:$0xff] }
  0xb6   : > { %590 = vrot.lane.b32.xlu2 %v3240_v51, %s2665_s30  ;;  %v3261_v43 = vld [vmem:[%s2746_s28 + $0x15a] sm:$0xff]  ;;  %274 = vst.msk [vmem:[#allocation2 + $0xd8] sm:$0xff] %vm246_vm1, %v3258_v39 }
  0xb7   : > { %v376_v44 = vpop.permute.xlu1 %375  ;;  %v374_v55 = vpop.permute.xlu0 %373 }
  0xb8   : > { %456 = vst.msk [vmem:[#allocation2 + $0x80] sm:$0xff] %vm439_vm2, %v376_v44  ;;  %v396_v40 = vpop.permute.xlu2 %395  ;;  %v3270_v44 = vld [vmem:[%s2746_s28 + $0x16a] sm:$0xff] }
  0xb9   : > { %455 = vst.msk [vmem:[#allocation2 + $0x78] sm:$0xff] %vm439_vm2, %v374_v55 }
  0xba   : > { %466 = vst.msk [vmem:[#allocation2 + $0xd0] sm:$0xff] %vm439_vm2, %v396_v40  ;;  %v3282_v40 = vld [vmem:[%s2746_s28 + $0x170] sm:$0xff] }
  0xbb   : > { %278 = vst.msk [vmem:[#allocation2 + $0xf8] sm:$0xff] %vm246_vm1, %v3282_v40 }
  0xbd   : > { %594 = vrot.lane.b32.xlu1 %v3261_v43, %s2665_s30  ;;  %592 = vrot.lane.b32.xlu0 %v3264_v35, %s2665_s30 }
  0xbe   : > { %596 = vrot.lane.b32.xlu2 %v3270_v44, %s2665_s30 }
  0xbf   : > { %v382_v55 = vpop.permute.xlu1 %381  ;;  %v380_v51 = vpop.permute.xlu0 %379 }
  0xc0   : > { %459 = vst.msk [vmem:[#allocation2 + $0x98] sm:$0xff] %vm439_vm2, %v382_v55  ;;  %v402_v32 = vpop.permute.xlu2 %401 }
  0xc1   : > { %458 = vst.msk [vmem:[#allocation2 + $0x90] sm:$0xff] %vm439_vm2, %v380_v51 }
  0xc2   : > { %469 = vst.msk [vmem:[#allocation2 + $0xe8] sm:$0xff] %vm439_vm2, %v402_v32 }
  0xc5   : > { %730 = vrot.lane.b32.xlu1 %v3011_v46, %s2666_s4  ;;  %598 = vrot.lane.b32.xlu0 %v503_v33, %s2665_s30 }
  0xc6   : > { %732 = vrot.lane.b32.xlu2 %v3027_v49, %s2666_s4 }
  0xc7   : > { %v388_v55 = vpop.permute.xlu1 %387  ;;  %v386_v51 = vpop.permute.xlu0 %385 }
  0xc8   : > { %462 = vst.msk [vmem:[#allocation2 + $0xb0] sm:$0xff] %vm439_vm2, %v388_v55  ;;  %v537_v32 = vpop.permute.xlu2 %536 }
  0xc9   : > { %461 = vst.msk [vmem:[#allocation2 + $0xa8] sm:$0xff] %vm439_vm2, %v386_v51 }
  0xca   : > { %633 = vst.msk [vmem:[#allocation2] sm:$0xff] %vm632_vm3, %v537_v32 }
  0xcd   : > { %736 = vrot.lane.b32.xlu1 %v3019_v48, %s2666_s4  ;;  %734 = vrot.lane.b32.xlu0 %v2891_v30, %s2666_s4 }
  0xce   : > { %738 = vrot.lane.b32.xlu2 %v3062_v59, %s2666_s4 }
  0xcf   : > { %v394_v33 = vpop.permute.xlu1 %393  ;;  %v392_v46 = vpop.permute.xlu0 %391 }
  0xd0   : > { %465 = vst.msk [vmem:[#allocation2 + $0xc8] sm:$0xff] %vm439_vm2, %v394_v33  ;;  %v543_v49 = vpop.permute.xlu2 %542  ;;  %v2294_v33 = vld [vmem:[%s2746_s28 + $0x180] sm:$0xff] }
  0xd1   : > { %464 = vst.msk [vmem:[#allocation2 + $0xc0] sm:$0xff] %vm439_vm2, %v392_v46  ;;  %v2295_v46 = vld [vmem:[%s2746_s28 + $0x188] sm:$0xff] }
  0xd2   : > { %636 = vst.msk [vmem:[#allocation2 + $0x18] sm:$0xff] %vm632_vm3, %v543_v49 }
  0xd5   : > { %742 = vrot.lane.b32.xlu1 %v3040_v54, %s2666_s4  ;;  %740 = vrot.lane.b32.xlu0 %v3058_v58, %s2666_s4 }
  0xd6   : > { %744 = vrot.lane.b32.xlu2 %v3087_v31, %s2666_s4 }
  0xd7   : > { %v400_v48 = vpop.permute.xlu1 %399  ;;  %v398_v30 = vpop.permute.xlu0 %397 }
  0xd8   : > { %468 = vst.msk [vmem:[#allocation2 + $0xe0] sm:$0xff] %vm439_vm2, %v400_v48  ;;  %v549_v55 = vpop.permute.xlu2 %548 }
  0xd9   : > { %467 = vst.msk [vmem:[#allocation2 + $0xd8] sm:$0xff] %vm439_vm2, %v398_v30 }
  0xda   : > { %639 = vst.msk [vmem:[#allocation2 + $0x30] sm:$0xff] %vm632_vm3, %v549_v55  ;;  %v4177_v55 = vld [vmem:[#allocation11_spill] sm:$0xff] }
  0xdd   : > { %748 = vrot.lane.b32.xlu1 %v3066_v61, %s2666_s4  ;;  %746 = vrot.lane.b32.xlu0 %v3079_v1, %s2666_s4 }
  0xde   : > { %750 = vrot.lane.b32.xlu2 %v3117_v56, %s2666_s4 }
  0xdf   : > { %v406_v54 = vpop.permute.xlu1 %405  ;;  %v404_v58 = vpop.permute.xlu0 %403 }
  0xe0   : > { %471 = vst.msk [vmem:[#allocation2 + $0xf8] sm:$0xff] %vm439_vm2, %v406_v54  ;;  %v555_v31 = vpop.permute.xlu2 %554 }
  0xe1   : > { %470 = vst.msk [vmem:[#allocation2 + $0xf0] sm:$0xff] %vm439_vm2, %v404_v58  ;;  %v4179_v58 = vld [vmem:[#allocation10_spill] sm:$0xff] }
  0xe2   : > { %642 = vst.msk [vmem:[#allocation2 + $0x48] sm:$0xff] %vm632_vm3, %v555_v31  ;;  %v2327_v31 = vld [vmem:[%s2746_s28 + $0x189] sm:$0xff] }
  0xe5   : > { %754 = vrot.lane.b32.xlu1 %v3101_v38, %s2666_s4  ;;  %752 = vrot.lane.b32.xlu0 %v3106_v47, %s2666_s4 }
  0xe6   : > { %756 = vrot.lane.b32.xlu2 %v3145_v50, %s2666_s4 }
  0xe7   : > { %v541_v61 = vpop.permute.xlu1 %540  ;;  %v539_v1 = vpop.permute.xlu0 %538 }
  0xe8   : > { %635 = vst.msk [vmem:[#allocation2 + $0x10] sm:$0xff] %vm632_vm3, %v541_v61  ;;  %v561_v51 = vpop.permute.xlu2 %560  ;;  %v2326_v61 = vld [vmem:[%s2746_s28 + $0x181] sm:$0xff] }
  0xe9   : > { %634 = vst.msk [vmem:[#allocation2 + $0x8] sm:$0xff] %vm632_vm3, %v539_v1 }
  0xea   : > { %645 = vst.msk [vmem:[#allocation2 + $0x60] sm:$0xff] %vm632_vm3, %v561_v51 }
  0xed   : > { %760 = vrot.lane.b32.xlu1 %v3121_v57, %s2666_s4  ;;  %758 = vrot.lane.b32.xlu0 %v3129_v34, %s2666_s4 }
  0xee   : > { %762 = vrot.lane.b32.xlu2 %v3164_v36, %s2666_s4 }
  0xef   : > { %v547_v38 = vpop.permute.xlu1 %546  ;;  %v545_v47 = vpop.permute.xlu0 %544 }
  0xf0   : > { %638 = vst.msk [vmem:[#allocation2 + $0x28] sm:$0xff] %vm632_vm3, %v547_v38  ;;  %v567_v50 = vpop.permute.xlu2 %566  ;;  %v4180_v38 = vld [vmem:[#allocation12_spill] sm:$0xff] }
  0xf1   : > { %637 = vst.msk [vmem:[#allocation2 + $0x20] sm:$0xff] %vm632_vm3, %v545_v47 }
  0xf2   : > { %648 = vst.msk [vmem:[#allocation2 + $0x78] sm:$0xff] %vm632_vm3, %v567_v50  ;;  %v4181_v50 = vld [vmem:[#allocation15_spill] sm:$0xff] }
  0xf5   : > { %766 = vrot.lane.b32.xlu1 %v3149_v53, %s2666_s4  ;;  %764 = vrot.lane.b32.xlu0 %v3159_v60, %s2666_s4 }
  0xf6   : > { %768 = vrot.lane.b32.xlu2 %v3192_v45, %s2666_s4 }
  0xf7   : > { %v553_v57 = vpop.permute.xlu1 %552  ;;  %v551_v34 = vpop.permute.xlu0 %550 }
  0xf8   : > { %641 = vst.msk [vmem:[#allocation2 + $0x40] sm:$0xff] %vm632_vm3, %v553_v57  ;;  %v573_v36 = vpop.permute.xlu2 %572  ;;  %v4182_v57 = vld [vmem:[#allocation13_spill] sm:$0xff] }
  0xf9   : > { %640 = vst.msk [vmem:[#allocation2 + $0x38] sm:$0xff] %vm632_vm3, %v551_v34 }
  0xfa   : > { %651 = vst.msk [vmem:[#allocation2 + $0x90] sm:$0xff] %vm632_vm3, %v573_v36 }
  0xfd   : > { %772 = vrot.lane.b32.xlu1 %v3172_v42, %s2666_s4  ;;  %770 = vrot.lane.b32.xlu0 %v3188_v62, %s2666_s4 }
  0xfe   : > { %774 = vrot.lane.b32.xlu2 %v3225_v52, %s2666_s4 }
  0xff   : > { %v559_v32 = vpop.permute.xlu1 %558  ;;  %v557_v60 = vpop.permute.xlu0 %556 }
 0x100   : > { %644 = vst.msk [vmem:[#allocation2 + $0x58] sm:$0xff] %vm632_vm3, %v559_v32  ;;  %v579_v45 = vpop.permute.xlu2 %578  ;;  %v4183_v32 = vld [vmem:[#allocation14_spill] sm:$0xff] }
 0x101   : > { %643 = vst.msk [vmem:[#allocation2 + $0x50] sm:$0xff] %vm632_vm3, %v557_v60 }
 0x102   : > { %654 = vst.msk [vmem:[#allocation2 + $0xa8] sm:$0xff] %vm632_vm3, %v579_v45  ;;  %v4184_v45 = vld [vmem:[#allocation18_spill] sm:$0xff] }
 0x105   : > { %778 = vrot.lane.b32.xlu1 %v3202_v63, %s2666_s4  ;;  %776 = vrot.lane.b32.xlu0 %v3221_v41, %s2666_s4 }
 0x106   : > { %780 = vrot.lane.b32.xlu2 %v3258_v39, %s2666_s4 }
 0x107   : > { %v565_v62 = vpop.permute.xlu1 %564  ;;  %v563_v42 = vpop.permute.xlu0 %562 }
 0x108   : > { %647 = vst.msk [vmem:[#allocation2 + $0x70] sm:$0xff] %vm632_vm3, %v565_v62  ;;  %v585_v52 = vpop.permute.xlu2 %584  ;;  %v4185_v62 = vld [vmem:[#allocation16_spill] sm:$0xff] }
 0x109   : > { %646 = vst.msk [vmem:[#allocation2 + $0x68] sm:$0xff] %vm632_vm3, %v563_v42 }
 0x10a   : > { %657 = vst.msk [vmem:[#allocation2 + $0xc0] sm:$0xff] %vm632_vm3, %v585_v52 }
 0x10d   : > { %784 = vrot.lane.b32.xlu1 %v3235_v37, %s2666_s4  ;;  %782 = vrot.lane.b32.xlu0 %v3254_v4, %s2666_s4 }
 0x10e   : > { %786 = vrot.lane.b32.xlu2 %v3286_v29, %s2666_s4 }
 0x10f   : > { %v571_v41 = vpop.permute.xlu1 %570  ;;  %v569_v63 = vpop.permute.xlu0 %568 }
 0x110   : > { %650 = vst.msk [vmem:[#allocation2 + $0x88] sm:$0xff] %vm632_vm3, %v571_v41  ;;  %v591_v39 = vpop.permute.xlu2 %590  ;;  %v4186_v41 = vld [vmem:[#allocation17_spill] sm:$0xff] }
 0x111   : > { %649 = vst.msk [vmem:[#allocation2 + $0x80] sm:$0xff] %vm632_vm3, %v569_v63 }
 0x112   : > { %660 = vst.msk [vmem:[#allocation2 + $0xd8] sm:$0xff] %vm632_vm3, %v591_v39  ;;  %v4187_v39 = vld [vmem:[#allocation21_spill] sm:$0xff] }
 0x115   : > { %790 = vrot.lane.b32.xlu1 %v2294_v33, %s2666_s4  ;;  %788 = vrot.lane.b32.xlu0 %v3282_v40, %s2666_s4  ;;  %v4188_v33 = vld [vmem:[#allocation19_spill] sm:$0xff] }
 0x116   : > { %792 = vrot.lane.b32.xlu2 %v2295_v46, %s2666_s4  ;;  %s3928_s4 = scalar_lea.vmem [#allocation3], %s2261_s29 }
 0x117   : > { %v577_v37 = vpop.permute.xlu1 %576  ;;  %v575_v49 = vpop.permute.xlu0 %574 }
 0x118   : > { %653 = vst.msk [vmem:[#allocation2 + $0xa0] sm:$0xff] %vm632_vm3, %v577_v37  ;;  %v597_v29 = vpop.permute.xlu2 %596 }
 0x119   : > { %652 = vst.msk [vmem:[#allocation2 + $0x98] sm:$0xff] %vm632_vm3, %v575_v49  ;;  %v4189_v49 = vld [vmem:[#allocation20_spill] sm:$0xff] }
 0x11a   : > { %663 = vst.msk [vmem:[#allocation2 + $0xf0] sm:$0xff] %vm632_vm3, %v597_v29 }
 0x11d   : > { %925 = vrot.lane.b32.xlu1 %v2761_v3, %s2667_s5  ;;  %923 = vrot.lane.b32.xlu0 %v2749_v0, %s2667_s5 }
 0x11e   : > { %927 = vrot.lane.b32.xlu2 %v2756_v2, %s2667_s5 }
 0x11f   : > { %v583_v48 = vpop.permute.xlu1 %582  ;;  %v581_v40 = vpop.permute.xlu0 %580 }
 0x120   : > { %656 = vst.msk [vmem:[#allocation2 + $0xb8] sm:$0xff] %vm632_vm3, %v583_v48  ;;  %v733_v30 = vpop.permute.xlu2 %732  ;;  %v4190_v48 = vld [vmem:[#allocation24_spill] sm:$0xff] }
 0x121   : > { %655 = vst.msk [vmem:[#allocation2 + $0xb0] sm:$0xff] %vm632_vm3, %v581_v40  ;;  %v4191_v40 = vld [vmem:[#allocation22_spill] sm:$0xff] }
 0x122   : > { %828 = vst.msk [vmem:[#allocation2 + $0x8] sm:$0xff] %vm826_vm4, %v733_v30 }
 0x125   : > { %931 = vrot.lane.b32.xlu1 %v2776_v7, %s2667_s5  ;;  %929 = vrot.lane.b32.xlu0 %v2765_v5, %s2667_s5 }
 0x126   : > { %933 = vrot.lane.b32.xlu2 %v2773_v6, %s2667_s5 }
 0x127   : > { %v589_v0 = vpop.permute.xlu1 %588  ;;  %v587_v3 = vpop.permute.xlu0 %586 }
 0x128   : > { %659 = vst.msk [vmem:[#allocation2 + $0xd0] sm:$0xff] %vm632_vm3, %v589_v0  ;;  %v739_v2 = vpop.permute.xlu2 %738 }
 0x129   : > { %658 = vst.msk [vmem:[#allocation2 + $0xc8] sm:$0xff] %vm632_vm3, %v587_v3  ;;  %v4192_v3 = vld [vmem:[#allocation23_spill] sm:$0xff] }
 0x12a   : > { %831 = vst.msk [vmem:[#allocation2 + $0x20] sm:$0xff] %vm826_vm4, %v739_v2 }
 0x12d   : > { %937 = vrot.lane.b32.xlu1 %v2791_v10, %s2667_s5  ;;  %935 = vrot.lane.b32.xlu0 %v2779_v8, %s2667_s5 }
 0x12e   : > { %939 = vrot.lane.b32.xlu2 %v2788_v9, %s2667_s5 }
 0x12f   : > { %v595_v7 = vpop.permute.xlu1 %594  ;;  %v593_v5 = vpop.permute.xlu0 %592 }
 0x130   : > { %662 = vst.msk [vmem:[#allocation2 + $0xe8] sm:$0xff] %vm632_vm3, %v595_v7  ;;  %v745_v6 = vpop.permute.xlu2 %744  ;;  %v4193_v7 = vld [vmem:[#allocation27_spill] sm:$0xff] }
 0x131   : > { %661 = vst.msk [vmem:[#allocation2 + $0xe0] sm:$0xff] %vm632_vm3, %v593_v5  ;;  %v4194_v5 = vld [vmem:[#allocation25_spill] sm:$0xff] }
 0x132   : > { %834 = vst.msk [vmem:[#allocation2 + $0x38] sm:$0xff] %vm826_vm4, %v745_v6 }
 0x135   : > { %943 = vrot.lane.b32.xlu1 %v2806_v13, %s2667_s5  ;;  %941 = vrot.lane.b32.xlu0 %v2794_v11, %s2667_s5 }
 0x136   : > { %945 = vrot.lane.b32.xlu2 %v2803_v12, %s2667_s5 }
 0x137   : > { %v731_v10 = vpop.permute.xlu1 %730  ;;  %v599_v8 = vpop.permute.xlu0 %598 }
 0x138   : > { %827 = vst.msk [vmem:[#allocation2] sm:$0xff] %vm826_vm4, %v731_v10  ;;  %v751_v9 = vpop.permute.xlu2 %750 }
 0x139   : > { %664 = vst.msk [vmem:[#allocation2 + $0xf8] sm:$0xff] %vm632_vm3, %v599_v8  ;;  %v4195_v8 = vld [vmem:[#allocation26_spill] sm:$0xff] }
 0x13a   : > { %837 = vst.msk [vmem:[#allocation2 + $0x50] sm:$0xff] %vm826_vm4, %v751_v9 }
 0x13d   : > { %949 = vrot.lane.b32.xlu1 %v2821_v16, %s2667_s5  ;;  %947 = vrot.lane.b32.xlu0 %v2809_v14, %s2667_s5 }
 0x13e   : > { %951 = vrot.lane.b32.xlu2 %v2818_v15, %s2667_s5 }
 0x13f   : > { %v737_v13 = vpop.permute.xlu1 %736  ;;  %v735_v11 = vpop.permute.xlu0 %734 }
 0x140   : > { %830 = vst.msk [vmem:[#allocation2 + $0x18] sm:$0xff] %vm826_vm4, %v737_v13  ;;  %v757_v12 = vpop.permute.xlu2 %756  ;;  %v4196_v13 = vld [vmem:[#allocation30_spill] sm:$0xff] }
 0x141   : > { %829 = vst.msk [vmem:[#allocation2 + $0x10] sm:$0xff] %vm826_vm4, %v735_v11  ;;  %v4197_v11 = vld [vmem:[#allocation28_spill] sm:$0xff] }
 0x142   : > { %840 = vst.msk [vmem:[#allocation2 + $0x68] sm:$0xff] %vm826_vm4, %v757_v12 }
 0x145   : > { %955 = vrot.lane.b32.xlu1 %v2836_v19, %s2667_s5  ;;  %953 = vrot.lane.b32.xlu0 %v2824_v17, %s2667_s5 }
 0x146   : > { %957 = vrot.lane.b32.xlu2 %v2833_v18, %s2667_s5 }
 0x147   : > { %v743_v16 = vpop.permute.xlu1 %742  ;;  %v741_v14 = vpop.permute.xlu0 %740 }
 0x148   : > { %833 = vst.msk [vmem:[#allocation2 + $0x30] sm:$0xff] %vm826_vm4, %v743_v16  ;;  %v763_v15 = vpop.permute.xlu2 %762 }
 0x149   : > { %832 = vst.msk [vmem:[#allocation2 + $0x28] sm:$0xff] %vm826_vm4, %v741_v14  ;;  %v4198_v14 = vld [vmem:[#allocation29_spill] sm:$0xff] }
 0x14a   : > { %843 = vst.msk [vmem:[#allocation2 + $0x80] sm:$0xff] %vm826_vm4, %v763_v15 }
 0x14d   : > { %961 = vrot.lane.b32.xlu1 %v2851_v22, %s2667_s5  ;;  %959 = vrot.lane.b32.xlu0 %v2839_v20, %s2667_s5 }
 0x14e   : > { %963 = vrot.lane.b32.xlu2 %v2848_v21, %s2667_s5 }
 0x14f   : > { %v749_v19 = vpop.permute.xlu1 %748  ;;  %v747_v17 = vpop.permute.xlu0 %746 }
 0x150   : > { %836 = vst.msk [vmem:[#allocation2 + $0x48] sm:$0xff] %vm826_vm4, %v749_v19  ;;  %v769_v18 = vpop.permute.xlu2 %768  ;;  %v4199_v19 = vld [vmem:[#allocation33_spill] sm:$0xff] }
 0x151   : > { %835 = vst.msk [vmem:[#allocation2 + $0x40] sm:$0xff] %vm826_vm4, %v747_v17  ;;  %v4200_v17 = vld [vmem:[#allocation31_spill] sm:$0xff] }
 0x152   : > { %846 = vst.msk [vmem:[#allocation2 + $0x98] sm:$0xff] %vm826_vm4, %v769_v18 }
 0x155   : > { %967 = vrot.lane.b32.xlu1 %v2866_v25, %s2667_s5  ;;  %965 = vrot.lane.b32.xlu0 %v2854_v23, %s2667_s5 }
 0x156   : > { %969 = vrot.lane.b32.xlu2 %v2863_v24, %s2667_s5 }
 0x157   : > { %v755_v22 = vpop.permute.xlu1 %754  ;;  %v753_v20 = vpop.permute.xlu0 %752 }
 0x158   : > { %839 = vst.msk [vmem:[#allocation2 + $0x60] sm:$0xff] %vm826_vm4, %v755_v22  ;;  %v775_v21 = vpop.permute.xlu2 %774 }
 0x159   : > { %838 = vst.msk [vmem:[#allocation2 + $0x58] sm:$0xff] %vm826_vm4, %v753_v20  ;;  %v4201_v20 = vld [vmem:[#allocation32_spill] sm:$0xff] }
 0x15a   : > { %849 = vst.msk [vmem:[#allocation2 + $0xb0] sm:$0xff] %vm826_vm4, %v775_v21 }
 0x15d   : > { %973 = vrot.lane.b32.xlu1 %v2881_v28, %s2667_s5  ;;  %971 = vrot.lane.b32.xlu0 %v2869_v26, %s2667_s5  ;;  %v4178_v28 = vld [vmem:[#allocation9_spill] sm:$0xff] }
 0x15e   : > { %975 = vrot.lane.b32.xlu2 %v2878_v27, %s2667_s5 }
 0x15f   : > { %v761_v23 = vpop.permute.xlu1 %760  ;;  %v759_v25 = vpop.permute.xlu0 %758 }
 0x160   : > { %842 = vst.msk [vmem:[#allocation2 + $0x78] sm:$0xff] %vm826_vm4, %v761_v23  ;;  %v781_v24 = vpop.permute.xlu2 %780  ;;  %v4202_v23 = vld [vmem:[#allocation36_spill] sm:$0xff] }
 0x161   : > { %841 = vst.msk [vmem:[#allocation2 + $0x70] sm:$0xff] %vm826_vm4, %v759_v25  ;;  %v4203_v25 = vld [vmem:[#allocation34_spill] sm:$0xff] }
 0x162   : > { %852 = vst.msk [vmem:[#allocation2 + $0xc8] sm:$0xff] %vm826_vm4, %v781_v24 }
 0x165   : > { %979 = vrot.lane.b32.xlu1 %v4177_v55, %s2667_s5  ;;  %977 = vrot.lane.b32.xlu0 %v4178_v28, %s2667_s5  ;;  %v4204_v28 = vld [vmem:[#allocation35_spill] sm:$0xff] }
 0x166   : > { %981 = vrot.lane.b32.xlu2 %v4179_v58, %s2667_s5 }
 0x167   : > { %v767_v26 = vpop.permute.xlu1 %766  ;;  %v765_v54 = vpop.permute.xlu0 %764 }
 0x168   : > { %845 = vst.msk [vmem:[#allocation2 + $0x90] sm:$0xff] %vm826_vm4, %v767_v26  ;;  %v787_v27 = vpop.permute.xlu2 %786 }
 0x169   : > { %844 = vst.msk [vmem:[#allocation2 + $0x88] sm:$0xff] %vm826_vm4, %v765_v54  ;;  %v4205_v54 = vld [vmem:[#allocation37_spill] sm:$0xff] }
 0x16a   : > { %855 = vst.msk [vmem:[#allocation2 + $0xe0] sm:$0xff] %vm826_vm4, %v787_v27 }
 0x16d   : > { %985 = vrot.lane.b32.xlu1 %v2327_v31, %s2667_s5  ;;  %983 = vrot.lane.b32.xlu0 %v2326_v61, %s2667_s5  ;;  %v2360_v61 = vld [vmem:[%s2746_s28 + $0x30] sm:$0xff] }
 0x16e   : > { %1116 = vrot.lane.b32.xlu2 %v4180_v38, %s2668_s6  ;;  %v2361_v38 = vld [vmem:[%s2746_s28 + $0x38] sm:$0xff] }
 0x16f   : > { %v773_v1 = vpop.permute.xlu1 %772  ;;  %v771_v51 = vpop.permute.xlu0 %770 }
 0x170   : > { %848 = vst.msk [vmem:[#allocation2 + $0xa8] sm:$0xff] %vm826_vm4, %v773_v1  ;;  %v793_v47 = vpop.permute.xlu2 %792 }
 0x171   : > { %847 = vst.msk [vmem:[#allocation2 + $0xa0] sm:$0xff] %vm826_vm4, %v771_v51 }
 0x172   : > { %858 = vst.msk [vmem:[#allocation2 + $0xf8] sm:$0xff] %vm826_vm4, %v793_v47  ;;  %v2424_v47 = vld [vmem:[%s2746_s28 + $0x32] sm:$0xff] }
 0x175   : > { %1120 = vrot.lane.b32.xlu1 %v4181_v50, %s2668_s6  ;;  %1118 = vrot.lane.b32.xlu0 %v4182_v57, %s2668_s6  ;;  %v2393_v50 = vld [vmem:[%s2746_s28 + $0x39] sm:$0xff] }
 0x176   : > { %1122 = vrot.lane.b32.xlu2 %v4183_v32, %s2668_s6 }
 0x177   : > { %v779_v34 = vpop.permute.xlu1 %778  ;;  %v777_v36 = vpop.permute.xlu0 %776 }
 0x178   : > { %851 = vst.msk [vmem:[#allocation2 + $0xc0] sm:$0xff] %vm826_vm4, %v779_v34  ;;  %v928_v60 = vpop.permute.xlu2 %927 }
 0x179   : > { %850 = vst.msk [vmem:[#allocation2 + $0xb8] sm:$0xff] %vm826_vm4, %v777_v36  ;;  %v2425_v36 = vld [vmem:[%s2746_s28 + $0x3a] sm:$0xff] }
 0x17a   : > { %1022 = vst.msk [vmem:[#allocation2 + $0x10] sm:$0xff] %vm1019_vm5, %v928_v60 }
 0x17d   : > { %1126 = vrot.lane.b32.xlu1 %v4184_v45, %s2668_s6  ;;  %1124 = vrot.lane.b32.xlu0 %v4185_v62, %s2668_s6  ;;  %v2400_v62 = vld [vmem:[%s2746_s28 + $0x91] sm:$0xff] }
 0x17e   : > { %1128 = vrot.lane.b32.xlu2 %v4186_v41, %s2668_s6 }
 0x17f   : > { %v785_v42 = vpop.permute.xlu1 %784  ;;  %v783_v52 = vpop.permute.xlu0 %782 }
 0x180   : > { %854 = vst.msk [vmem:[#allocation2 + $0xd8] sm:$0xff] %vm826_vm4, %v785_v42  ;;  %v934_v63 = vpop.permute.xlu2 %933  ;;  %v2394_v42 = vld [vmem:[%s2746_s28 + $0x49] sm:$0xff] }
 0x181   : > { %853 = vst.msk [vmem:[#allocation2 + $0xd0] sm:$0xff] %vm826_vm4, %v783_v52 }
 0x182   : > { %1025 = vst.msk [vmem:[#allocation2 + $0x28] sm:$0xff] %vm1019_vm5, %v934_v63  ;;  %v2363_v63 = vld [vmem:[%s2746_s28 + $0x50] sm:$0xff] }
 0x185   : > { %1132 = vrot.lane.b32.xlu1 %v4187_v39, %s2668_s6  ;;  %1130 = vrot.lane.b32.xlu0 %v4188_v33, %s2668_s6  ;;  %v2432_v39 = vld [vmem:[%s2746_s28 + $0x92] sm:$0xff] }
 0x186   : > { %1134 = vrot.lane.b32.xlu2 %v4189_v49, %s2668_s6  ;;  %v2369_v33 = vld [vmem:[%s2746_s28 + $0x98] sm:$0xff] }
 0x187   : > { %v791_v46 = vpop.permute.xlu1 %790  ;;  %v789_v37 = vpop.permute.xlu0 %788 }
 0x188   : > { %857 = vst.msk [vmem:[#allocation2 + $0xf0] sm:$0xff] %vm826_vm4, %v791_v46  ;;  %v940_v29 = vpop.permute.xlu2 %939 }
 0x189   : > { %856 = vst.msk [vmem:[#allocation2 + $0xe8] sm:$0xff] %vm826_vm4, %v789_v37 }
 0x18a   : > { %1028 = vst.msk [vmem:[#allocation2 + $0x40] sm:$0xff] %vm1019_vm5, %v940_v29  ;;  %v2401_v29 = vld [vmem:[%s2746_s28 + $0x99] sm:$0xff] }
 0x18d   : > { %1138 = vrot.lane.b32.xlu1 %v4190_v48, %s2668_s6  ;;  %1136 = vrot.lane.b32.xlu0 %v4191_v40, %s2668_s6  ;;  %v2395_v48 = vld [vmem:[%s2746_s28 + $0x51] sm:$0xff] }
 0x18e   : > { %1140 = vrot.lane.b32.xlu2 %v4192_v3, %s2668_s6  ;;  %v2433_v3 = vld [vmem:[%s2746_s28 + $0x9a] sm:$0xff] }
 0x18f   : > { %v926_v30 = vpop.permute.xlu1 %925  ;;  %v924_v0 = vpop.permute.xlu0 %923 }
 0x190   : > { %1021 = vst.msk [vmem:[#allocation2 + $0x8] sm:$0xff] %vm1019_vm5, %v926_v30  ;;  %v946_v2 = vpop.permute.xlu2 %945 }
 0x191   : > { %1020 = vst.msk [vmem:[#allocation2] sm:$0xff] %vm1019_vm5, %v924_v0 }
 0x192   : > { %1031 = vst.msk [vmem:[#allocation2 + $0x58] sm:$0xff] %vm1019_vm5, %v946_v2  ;;  %v2427_v2 = vld [vmem:[%s2746_s28 + $0x52] sm:$0xff] }
 0x195   : > { %1144 = vrot.lane.b32.xlu1 %v4193_v7, %s2668_s6  ;;  %1142 = vrot.lane.b32.xlu0 %v4194_v5, %s2668_s6  ;;  %v2408_v7 = vld [vmem:[%s2746_s28 + $0xf1] sm:$0xff] }
 0x196   : > { %1146 = vrot.lane.b32.xlu2 %v4195_v8, %s2668_s6  ;;  %v2440_v8 = vld [vmem:[%s2746_s28 + $0xf2] sm:$0xff] }
 0x197   : > { %v932_v6 = vpop.permute.xlu1 %931  ;;  %v930_v10 = vpop.permute.xlu0 %929 }
 0x198   : > { %1024 = vst.msk [vmem:[#allocation2 + $0x20] sm:$0xff] %vm1019_vm5, %v932_v6  ;;  %v952_v9 = vpop.permute.xlu2 %951 }
 0x199   : > { %1023 = vst.msk [vmem:[#allocation2 + $0x18] sm:$0xff] %vm1019_vm5, %v930_v10  ;;  %v2364_v10 = vld [vmem:[%s2746_s28 + $0x60] sm:$0xff] }
 0x19a   : > { %1034 = vst.msk [vmem:[#allocation2 + $0x70] sm:$0xff] %vm1019_vm5, %v952_v9  ;;  %v2370_v9 = vld [vmem:[%s2746_s28 + $0xa8] sm:$0xff] }
 0x19d   : > { %1150 = vrot.lane.b32.xlu1 %v4196_v13, %s2668_s6  ;;  %1148 = vrot.lane.b32.xlu0 %v4197_v11, %s2668_s6 }
 0x19e   : > { %1152 = vrot.lane.b32.xlu2 %v4198_v14, %s2668_s6  ;;  %v2396_v14 = vld [vmem:[%s2746_s28 + $0x61] sm:$0xff] }
 0x19f   : > { %v938_v12 = vpop.permute.xlu1 %937  ;;  %v936_v16 = vpop.permute.xlu0 %935 }
 0x1a0   : > { %1027 = vst.msk [vmem:[#allocation2 + $0x38] sm:$0xff] %vm1019_vm5, %v938_v12  ;;  %v958_v15 = vpop.permute.xlu2 %957 }
 0x1a1   : > { %1026 = vst.msk [vmem:[#allocation2 + $0x30] sm:$0xff] %vm1019_vm5, %v936_v16  ;;  %v2402_v16 = vld [vmem:[%s2746_s28 + $0xa9] sm:$0xff] }
 0x1a2   : > { %1037 = vst.msk [vmem:[#allocation2 + $0x88] sm:$0xff] %vm1019_vm5, %v958_v15  ;;  %v2377_v15 = vld [vmem:[%s2746_s28 + $0xf8] sm:$0xff] }
 0x1a5   : > { %1156 = vrot.lane.b32.xlu1 %v4199_v19, %s2668_s6  ;;  %1154 = vrot.lane.b32.xlu0 %v4200_v17, %s2668_s6 }
 0x1a6   : > { %1158 = vrot.lane.b32.xlu2 %v4201_v20, %s2668_s6  ;;  %v1871_v20 = vld [vmem:[%s4114_s1 + $0x70] sm:$0xff] }
 0x1a7   : > { %v944_v18 = vpop.permute.xlu1 %943  ;;  %v942_v22 = vpop.permute.xlu0 %941 }
 0x1a8   : > { %1030 = vst.msk [vmem:[#allocation2 + $0x50] sm:$0xff] %vm1019_vm5, %v944_v18  ;;  %v964_v21 = vpop.permute.xlu2 %963 }
 0x1a9   : > { %1029 = vst.msk [vmem:[#allocation2 + $0x48] sm:$0xff] %vm1019_vm5, %v942_v22  ;;  %v1872_v22 = vld [vmem:[%s4114_s1 + $0x78] sm:$0xff] }
 0x1aa   : > { %1040 = vst.msk [vmem:[#allocation2 + $0xa0] sm:$0xff] %vm1019_vm5, %v964_v21  ;;  %v2434_v21 = vld [vmem:[%s2746_s28 + $0xaa] sm:$0xff]  ;;  %1873 = vmatpush.msra.mxu0 %v1872_v22  ;;  %2464 = vmatpush.msra.mxu1 %v1872_v22 }
 0x1ab   : > { %2465 = vmatpush.msra.mxu2 %v1872_v22  ;;  %2466 = vmatpush.msra.mxu3 %v1872_v22  ;;  %v2417_v22 = vld [vmem:[%s2746_s28 + $0x159] sm:$0xff] }
 0x1ac   : > { %1874 = vmatpush.msra.mxu0 %v1871_v20  ;;  %2467 = vmatpush.msra.mxu1 %v1871_v20 }
 0x1ad   : > { %1162 = vrot.lane.b32.xlu1 %v4202_v23, %s2668_s6  ;;  %1160 = vrot.lane.b32.xlu0 %v4203_v25, %s2668_s6  ;;  %v2428_v23 = vld [vmem:[%s2746_s28 + $0x62] sm:$0xff] }
 0x1ae   : > { %1164 = vrot.lane.b32.xlu2 %v4204_v28, %s2668_s6  ;;  %v1870_v25 = vld [vmem:[%s4114_s1 + $0x68] sm:$0xff]  ;;  %2468 = vmatpush.msra.mxu2 %v1871_v20 }
 0x1af   : > { %v950_v24 = vpop.permute.xlu1 %949  ;;  %v948_v55 = vpop.permute.xlu0 %947  ;;  %1875 = vmatpush.msra.mxu0 %v1870_v25  ;;  %2470 = vmatpush.msra.mxu1 %v1870_v25 }
 0x1b0   : > { %1033 = vst.msk [vmem:[#allocation2 + $0x68] sm:$0xff] %vm1019_vm5, %v950_v24  ;;  %v970_v26 = vpop.permute.xlu2 %969  ;;  %v2409_v24 = vld [vmem:[%s2746_s28 + $0xf9] sm:$0xff]  ;;  %2471 = vmatpush.msra.mxu2 %v1870_v25  ;;  %2469 = vmatpush.msra.mxu3 %v1871_v20  ;;  %v2411_v20 = vld [vmem:[%s2746_s28 + $0x111] sm:$0xff] }
 0x1b1   : > { %1032 = vst.msk [vmem:[#allocation2 + $0x60] sm:$0xff] %vm1019_vm5, %v948_v55  ;;  %v1869_v55 = vld [vmem:[%s4114_s1 + $0x60] sm:$0xff] }
 0x1b2   : > { %1043 = vst.msk [vmem:[#allocation2 + $0xb8] sm:$0xff] %vm1019_vm5, %v970_v26  ;;  %1876 = vmatpush.msra.mxu0 %v1869_v55  ;;  %2473 = vmatpush.msra.mxu1 %v1869_v55 }
 0x1b3   : > { %2474 = vmatpush.msra.mxu2 %v1869_v55  ;;  %2472 = vmatpush.msra.mxu3 %v1870_v25 }
 0x1b5   : > { %1168 = vrot.lane.b32.xlu1 %v3264_v35, %s2668_s6  ;;  %1166 = vrot.lane.b32.xlu0 %v4205_v54, %s2668_s6  ;;  %v2392_v35 = vld [vmem:[%s2746_s28 + $0x31] sm:$0xff] }
 0x1b6   : > { %1170 = vrot.lane.b32.xlu2 %v3261_v43, %s2668_s6  ;;  %2475 = vmatpush.msra.mxu3 %v1869_v55 }
 0x1b7   : > { %v956_v58 = vpop.permute.xlu1 %955  ;;  %v954_v27 = vpop.permute.xlu0 %953 }
 0x1b8   : > { %1036 = vst.msk [vmem:[#allocation2 + $0x80] sm:$0xff] %vm1019_vm5, %v956_v58  ;;  %v976_v31 = vpop.permute.xlu2 %975  ;;  %v1868_v58 = vld [vmem:[%s4114_s1 + $0x58] sm:$0xff] }
 0x1b9   : > { %1035 = vst.msk [vmem:[#allocation2 + $0x78] sm:$0xff] %vm1019_vm5, %v954_v27  ;;  %v1867_v27 = vld [vmem:[%s4114_s1 + $0x50] sm:$0xff]  ;;  %1877 = vmatpush.msra.mxu0 %v1868_v58  ;;  %2476 = vmatpush.msra.mxu1 %v1868_v58 }
 0x1ba   : > { %1046 = vst.msk [vmem:[#allocation2 + $0xd0] sm:$0xff] %vm1019_vm5, %v976_v31  ;;  %v2365_v31 = vld [vmem:[%s2746_s28 + $0x68] sm:$0xff]  ;;  %2477 = vmatpush.msra.mxu2 %v1868_v58  ;;  %2478 = vmatpush.msra.mxu3 %v1868_v58 }
 0x1bb   : > { %1878 = vmatpush.msra.mxu0 %v1867_v27  ;;  %2479 = vmatpush.msra.mxu1 %v1867_v27 }
 0x1bc   : > { %2480 = vmatpush.msra.mxu2 %v1867_v27  ;;  %2481 = vmatpush.msra.mxu3 %v1867_v27 }
 0x1bd   : > { %1310 = vrot.lane.b32.xlu1 %v2360_v61, %s2669_s7  ;;  %1172 = vrot.lane.b32.xlu0 %v3270_v44, %s2668_s6  ;;  %v2441_v61 = vld [vmem:[%s2746_s28 + $0xfa] sm:$0xff] }
 0x1be   : > { %1503 = vrot.lane.b32.xlu2 %v2392_v35, %s2670_s8  ;;  %v1866_v35 = vld [vmem:[%s4114_s1 + $0x48] sm:$0xff] }
 0x1bf   : > { %v962_v1 = vpop.permute.xlu1 %961  ;;  %v960_v43 = vpop.permute.xlu0 %959  ;;  %1879 = vmatpush.msra.mxu0 %v1866_v35  ;;  %2482 = vmatpush.msra.mxu1 %v1866_v35 }
 0x1c0   : > { %1039 = vst.msk [vmem:[#allocation2 + $0x98] sm:$0xff] %vm1019_vm5, %v962_v1  ;;  %v982_v51 = vpop.permute.xlu2 %981  ;;  %v2371_v1 = vld [vmem:[%s2746_s28 + $0xb0] sm:$0xff]  ;;  %2483 = vmatpush.msra.mxu2 %v1866_v35  ;;  %2484 = vmatpush.msra.mxu3 %v1866_v35 }
 0x1c1   : > { %1038 = vst.msk [vmem:[#allocation2 + $0x90] sm:$0xff] %vm1019_vm5, %v960_v43  ;;  %v3691_v43 = vld [vmem:[%s4114_s1 + $0x40] sm:$0xff]  ;;  %v2405_v35 = vld [vmem:[%s2746_s28 + $0xc9] sm:$0xff] }
 0x1c2   : > { %1049 = vst.msk [vmem:[#allocation2 + $0xe8] sm:$0xff] %vm1019_vm5, %v982_v51  ;;  %1880 = vmatpush.msra.mxu0 %v3691_v43  ;;  %2485 = vmatpush.msra.mxu1 %v3691_v43 }
 0x1c3   : > { %2486 = vmatpush.msra.mxu2 %v3691_v43  ;;  %2487 = vmatpush.msra.mxu3 %v3691_v43  ;;  %v2380_v43 = vld [vmem:[%s2746_s28 + $0x120] sm:$0xff] }
 0x1c5   : > { %1312 = vrot.lane.b32.xlu1 %v2361_v38, %s2669_s7  ;;  %1696 = vrot.lane.b32.xlu0 %v2424_v47, %s2671_s9 }
 0x1c6   : > { %1505 = vrot.lane.b32.xlu2 %v2393_v50, %s2670_s8  ;;  %v1864_v50 = vld [vmem:[%s4114_s1 + $0x38] sm:$0xff] }
 0x1c7   : > { %v968_v44 = vpop.permute.xlu1 %967  ;;  %v966_v57 = vpop.permute.xlu0 %965  ;;  %1881 = vmatpush.msra.mxu0 %v1864_v50  ;;  %2488 = vmatpush.msra.mxu1 %v1864_v50 }
 0x1c8   : > { %1042 = vst.msk [vmem:[#allocation2 + $0xb0] sm:$0xff] %vm1019_vm5, %v968_v44  ;;  %v1117_v34 = vpop.permute.xlu2 %1116  ;;  %v3704_v44 = vld [vmem:[%s4114_s1 + $0x30] sm:$0xff]  ;;  %2489 = vmatpush.msra.mxu2 %v1864_v50  ;;  %2490 = vmatpush.msra.mxu3 %v1864_v50 }
 0x1c9   : > { %1041 = vst.msk [vmem:[#allocation2 + $0xa8] sm:$0xff] %vm1019_vm5, %v966_v57  ;;  %v2403_v57 = vld [vmem:[%s2746_s28 + $0xb1] sm:$0xff]  ;;  %1882 = vmatpush.msra.mxu0 %v3704_v44  ;;  %2491 = vmatpush.msra.mxu1 %v3704_v44 }
 0x1ca   : > { %1213 = vst.msk [vmem:[#allocation2] sm:$0xff] %vm1212_vm6, %v1117_v34  ;;  %v2397_v34 = vld [vmem:[%s2746_s28 + $0x69] sm:$0xff]  ;;  %2492 = vmatpush.msra.mxu2 %v3704_v44  ;;  %2493 = vmatpush.msra.mxu3 %v3704_v44 }
 0x1cb   : > { %v2431_v44 = vld [vmem:[%s2746_s28 + $0x82] sm:$0xff] }
 0x1cd   : > { %1314 = vrot.lane.b32.xlu1 %v3062_v59, %s2669_s7  ;;  %1698 = vrot.lane.b32.xlu0 %v2425_v36, %s2671_s9  ;;  %v2426_v59 = vld [vmem:[%s2746_s28 + $0x4a] sm:$0xff] }
 0x1ce   : > { %1326 = vrot.lane.b32.xlu2 %v3117_v56, %s2669_s7  ;;  %v1862_v36 = vld [vmem:[%s4114_s1 + $0x28] sm:$0xff] }
 0x1cf   : > { %v974_v32 = vpop.permute.xlu1 %973  ;;  %v972_v60 = vpop.permute.xlu0 %971  ;;  %1883 = vmatpush.msra.mxu0 %v1862_v36  ;;  %2494 = vmatpush.msra.mxu1 %v1862_v36 }
 0x1d0   : > { %1045 = vst.msk [vmem:[#allocation2 + $0xc8] sm:$0xff] %vm1019_vm5, %v974_v32  ;;  %v1123_v45 = vpop.permute.xlu2 %1122  ;;  %v2378_v32 = vld [vmem:[%s2746_s28 + $0x108] sm:$0xff]  ;;  %2495 = vmatpush.msra.mxu2 %v1862_v36  ;;  %2496 = vmatpush.msra.mxu3 %v1862_v36 }
 0x1d1   : > { %1044 = vst.msk [vmem:[#allocation2 + $0xc0] sm:$0xff] %vm1019_vm5, %v972_v60  ;;  %v1861_v60 = vld [vmem:[%s4114_s1 + $0x20] sm:$0xff] }
 0x1d2   : > { %1216 = vst.msk [vmem:[#allocation2 + $0x18] sm:$0xff] %vm1212_vm6, %v1123_v45  ;;  %1884 = vmatpush.msra.mxu0 %v1861_v60  ;;  %2497 = vmatpush.msra.mxu1 %v1861_v60 }
 0x1d3   : > { %2498 = vmatpush.msra.mxu2 %v1861_v60  ;;  %2499 = vmatpush.msra.mxu3 %v1861_v60 }
 0x1d5   : > { %1519 = vrot.lane.b32.xlu1 %v2400_v62, %s2670_s8  ;;  %1507 = vrot.lane.b32.xlu0 %v2394_v42, %s2670_s8 }
 0x1d6   : > { %1700 = vrot.lane.b32.xlu2 %v2426_v59, %s2671_s9  ;;  %v1860_v59 = vld [vmem:[%s4114_s1 + $0x18] sm:$0xff] }
 0x1d7   : > { %v980_v52 = vpop.permute.xlu1 %979  ;;  %v978_v41 = vpop.permute.xlu0 %977  ;;  %1885 = vmatpush.msra.mxu0 %v1860_v59  ;;  %2500 = vmatpush.msra.mxu1 %v1860_v59 }
 0x1d8   : > { %1048 = vst.msk [vmem:[#allocation2 + $0xe0] sm:$0xff] %vm1019_vm5, %v980_v52  ;;  %v1129_v56 = vpop.permute.xlu2 %1128  ;;  %v2429_v52 = vld [vmem:[%s2746_s28 + $0x6a] sm:$0xff]  ;;  %2501 = vmatpush.msra.mxu2 %v1860_v59  ;;  %2502 = vmatpush.msra.mxu3 %v1860_v59 }
 0x1d9   : > { %1047 = vst.msk [vmem:[#allocation2 + $0xd8] sm:$0xff] %vm1019_vm5, %v978_v41  ;;  %v1859_v41 = vld [vmem:[%s4114_s1 + $0x10] sm:$0xff] }
 0x1da   : > { %1219 = vst.msk [vmem:[#allocation2 + $0x30] sm:$0xff] %vm1212_vm6, %v1129_v56  ;;  %v1858_v56 = vld [vmem:[%s4114_s1 + $0x8] sm:$0xff]  ;;  %1886 = vmatpush.msra.mxu0 %v1859_v41  ;;  %2503 = vmatpush.msra.mxu1 %v1859_v41 }
 0x1db   : > { %2504 = vmatpush.msra.mxu2 %v1859_v41  ;;  %2505 = vmatpush.msra.mxu3 %v1859_v41 }
 0x1dc   : > { %1887 = vmatpush.msra.mxu0 %v1858_v56  ;;  %2506 = vmatpush.msra.mxu1 %v1858_v56 }
 0x1dd   : > { %1316 = vrot.lane.b32.xlu1 %v2363_v63, %s2669_s7  ;;  %1712 = vrot.lane.b32.xlu0 %v2432_v39, %s2671_s9  ;;  %v2435_v63 = vld [vmem:[%s2746_s28 + $0xb2] sm:$0xff]  ;;  %v1857_v39 = vld [vmem:[%s4114_s1] sm:$0xff] }
 0x1de   : > { %1328 = vrot.lane.b32.xlu2 %v2369_v33, %s2669_s7  ;;  %1888 = vmatpush.msra.mxu0 %v1857_v39 }
 0x1df   : > { %v986_v46 = vpop.permute.xlu1 %985  ;;  %v984_v37 = vpop.permute.xlu0 %983  ;;  %2509 = vmatpush.msra.mxu1 %v1857_v39  ;;  %2507 = vmatpush.msra.mxu2 %v1858_v56 }
 0x1e0   : > { %1051 = vst.msk [vmem:[#allocation2 + $0xf8] sm:$0xff] %vm1019_vm5, %v986_v46  ;;  %v1135_v49 = vpop.permute.xlu2 %1134  ;;  %2508 = vmatpush.msra.mxu3 %v1858_v56 }
 0x1e1   : > { %1050 = vst.msk [vmem:[#allocation2 + $0xf0] sm:$0xff] %vm1019_vm5, %v984_v37  ;;  %v2416_v37 = vld [vmem:[%s2746_s28 + $0x151] sm:$0xff]  ;;  %2510 = vmatpush.msra.mxu2 %v1857_v39 }
 0x1e2   : > { %1222 = vst.msk [vmem:[#allocation2 + $0x48] sm:$0xff] %vm1212_vm6, %v1135_v49  ;;  %v2410_v49 = vld [vmem:[%s2746_s28 + $0x109] sm:$0xff]  ;;  %2511 = vmatpush.msra.mxu3 %v1857_v39  ;;  %v2374_v39 = vld [vmem:[%s2746_s28 + $0xd8] sm:$0xff] }
 0x1e5   : > { %1521 = vrot.lane.b32.xlu1 %v2401_v29, %s2670_s8  ;;  %1509 = vrot.lane.b32.xlu0 %v2395_v48, %s2670_s8  ;;  %v2442_v29 = vld [vmem:[%s2746_s28 + $0x10a] sm:$0xff] }
 0x1e6   : > { %1342 = vrot.lane.b32.xlu2 %v3149_v53, %s2669_s7 }
 0x1e7   : > { %v1121_v40 = vpop.permute.xlu1 %1120  ;;  %v1119_v30 = vpop.permute.xlu0 %1118 }
 0x1e8   : > { %1215 = vst.msk [vmem:[#allocation2 + $0x10] sm:$0xff] %vm1212_vm6, %v1121_v40  ;;  %v1141_v0 = vpop.permute.xlu2 %1140 }
 0x1e9   : > { %1214 = vst.msk [vmem:[#allocation2 + $0x8] sm:$0xff] %vm1212_vm6, %v1119_v30 }
 0x1ea   : > { %1225 = vst.msk [vmem:[#allocation2 + $0x60] sm:$0xff] %vm1212_vm6, %v1141_v0  ;;  %v2366_v0 = vld [vmem:[%s2746_s28 + $0x78] sm:$0xff] }
 0x1ed   : > { %1714 = vrot.lane.b32.xlu1 %v2433_v3, %s2671_s9  ;;  %1702 = vrot.lane.b32.xlu0 %v2427_v2, %s2671_s9  ;;  %v2448_v3 = vld [vmem:[%s2746_s28 + $0x152] sm:$0xff]  ;;  %v2372_v2 = vld [vmem:[%s2746_s28 + $0xc0] sm:$0xff] }
 0x1ee   : > { %1535 = vrot.lane.b32.xlu2 %v2408_v7, %s2670_s8 }
 0x1ef   : > { %v1127_v5 = vpop.permute.xlu1 %1126  ;;  %v1125_v6 = vpop.permute.xlu0 %1124 }
 0x1f0   : > { %1218 = vst.msk [vmem:[#allocation2 + $0x28] sm:$0xff] %vm1212_vm6, %v1127_v5  ;;  %v1147_v53 = vpop.permute.xlu2 %1146 }
 0x1f1   : > { %1217 = vst.msk [vmem:[#allocation2 + $0x20] sm:$0xff] %vm1212_vm6, %v1125_v6 }
 0x1f2   : > { %1228 = vst.msk [vmem:[#allocation2 + $0x78] sm:$0xff] %vm1212_vm6, %v1147_v53  ;;  %v2404_v53 = vld [vmem:[%s2746_s28 + $0xc1] sm:$0xff] }
 0x1f5   : > { %1318 = vrot.lane.b32.xlu1 %v2364_v10, %s2669_s7  ;;  %1728 = vrot.lane.b32.xlu0 %v2440_v8, %s2671_s9  ;;  %v2398_v10 = vld [vmem:[%s2746_s28 + $0x79] sm:$0xff]  ;;  %v2379_v8 = vld [vmem:[%s2746_s28 + $0x110] sm:$0xff] }
 0x1f6   : > { %1330 = vrot.lane.b32.xlu2 %v2370_v9, %s2669_s7 }
 0x1f7   : > { %v1133_v13 = vpop.permute.xlu1 %1132  ;;  %v1131_v11 = vpop.permute.xlu0 %1130 }
 0x1f8   : > { %1221 = vst.msk [vmem:[#allocation2 + $0x40] sm:$0xff] %vm1212_vm6, %v1133_v13  ;;  %v1153_v12 = vpop.permute.xlu2 %1152 }
 0x1f9   : > { %1220 = vst.msk [vmem:[#allocation2 + $0x38] sm:$0xff] %vm1212_vm6, %v1131_v11 }
 0x1fa   : > { %1231 = vst.msk [vmem:[#allocation2 + $0x90] sm:$0xff] %vm1212_vm6, %v1153_v12  ;;  %v2430_v12 = vld [vmem:[%s2746_s28 + $0x7a] sm:$0xff] }
 0x1fd   : > { %1523 = vrot.lane.b32.xlu1 %v2402_v16, %s2670_s8  ;;  %1511 = vrot.lane.b32.xlu0 %v2396_v14, %s2670_s8  ;;  %v2385_v16 = vld [vmem:[%s2746_s28 + $0x158] sm:$0xff]  ;;  %v2436_v14 = vld [vmem:[%s2746_s28 + $0xc2] sm:$0xff] }
 0x1fe   : > { %1344 = vrot.lane.b32.xlu2 %v2377_v15, %s2669_s7 }
 0x1ff   : > { %v1139_v19 = vpop.permute.xlu1 %1138  ;;  %v1137_v17 = vpop.permute.xlu0 %1136 }
 0x200   : > { %1224 = vst.msk [vmem:[#allocation2 + $0x58] sm:$0xff] %vm1212_vm6, %v1139_v19  ;;  %v1159_v18 = vpop.permute.xlu2 %1158 }
 0x201   : > { %1223 = vst.msk [vmem:[#allocation2 + $0x50] sm:$0xff] %vm1212_vm6, %v1137_v17 }
 0x202   : > { %1234 = vst.msk [vmem:[#allocation2 + $0xa8] sm:$0xff] %vm1212_vm6, %v1159_v18 }
 0x205   : > { %1716 = vrot.lane.b32.xlu1 %v2434_v21, %s2671_s9  ;;  %1704 = vrot.lane.b32.xlu0 %v2428_v23, %s2671_s9  ;;  %v2443_v21 = vld [vmem:[%s2746_s28 + $0x112] sm:$0xff] }
 0x206   : > { %1537 = vrot.lane.b32.xlu2 %v2409_v24, %s2670_s8 }
 0x207   : > { %v1145_v28 = vpop.permute.xlu1 %1144  ;;  %v1143_v26 = vpop.permute.xlu0 %1142 }
 0x208   : > { %1227 = vst.msk [vmem:[#allocation2 + $0x70] sm:$0xff] %vm1212_vm6, %v1145_v28  ;;  %v1165_v54 = vpop.permute.xlu2 %1164  ;;  %v2367_v28 = vld [vmem:[%s2746_s28 + $0x80] sm:$0xff] }
 0x209   : > { %1226 = vst.msk [vmem:[#allocation2 + $0x68] sm:$0xff] %vm1212_vm6, %v1143_v26  ;;  %v2449_v26 = vld [vmem:[%s2746_s28 + $0x15a] sm:$0xff] }
 0x20a   : > { %1237 = vst.msk [vmem:[#allocation2 + $0xc0] sm:$0xff] %vm1212_vm6, %v1165_v54  ;;  %v2373_v54 = vld [vmem:[%s2746_s28 + $0xc8] sm:$0xff] }
 0x20d   : > { %1320 = vrot.lane.b32.xlu1 %v2365_v31, %s2669_s7  ;;  %1730 = vrot.lane.b32.xlu0 %v2441_v61, %s2671_s9 }
 0x20e   : > { %1332 = vrot.lane.b32.xlu2 %v2371_v1, %s2669_s7  ;;  %v2399_v1 = vld [vmem:[%s2746_s28 + $0x81] sm:$0xff] }
 0x20f   : > { %v1151_v51 = vpop.permute.xlu1 %1150  ;;  %v1149_v38 = vpop.permute.xlu0 %1148 }
 0x210   : > { %1230 = vst.msk [vmem:[#allocation2 + $0x88] sm:$0xff] %vm1212_vm6, %v1151_v51  ;;  %v1171_v47 = vpop.permute.xlu2 %1170 }
 0x211   : > { %1229 = vst.msk [vmem:[#allocation2 + $0x80] sm:$0xff] %vm1212_vm6, %v1149_v38 }
 0x212   : > { %1240 = vst.msk [vmem:[#allocation2 + $0xd8] sm:$0xff] %vm1212_vm6, %v1171_v47 }
 0x215   : > { %1525 = vrot.lane.b32.xlu1 %v2403_v57, %s2670_s8  ;;  %1513 = vrot.lane.b32.xlu0 %v2397_v34, %s2670_s8  ;;  %v2386_v57 = vld [vmem:[%s2746_s28 + $0x168] sm:$0xff] }
 0x216   : > { %1346 = vrot.lane.b32.xlu2 %v2378_v32, %s2669_s7  ;;  %v2437_v34 = vld [vmem:[%s2746_s28 + $0xca] sm:$0xff] }
 0x217   : > { %v1157_v45 = vpop.permute.xlu1 %1156  ;;  %v1155_v62 = vpop.permute.xlu0 %1154 }
 0x218   : > { %1233 = vst.msk [vmem:[#allocation2 + $0xa0] sm:$0xff] %vm1212_vm6, %v1157_v45  ;;  %v3724_v42 = vpop.permute.xlu2 %1503  ;;  %v2418_v45 = vld [vmem:[%s2746_s28 + $0x169] sm:$0xff] }
 0x219   : > { %1232 = vst.msk [vmem:[#allocation2 + $0x98] sm:$0xff] %vm1212_vm6, %v1155_v62  ;;  %v2412_v62 = vld [vmem:[%s2746_s28 + $0x121] sm:$0xff] }
 0x21d   : > { %1706 = vrot.lane.b32.xlu1 %v2429_v52, %s2671_s9  ;;  %1358 = vrot.lane.b32.xlu0 %v3254_v4, %s2669_s7 }
 0x21e   : > { %1718 = vrot.lane.b32.xlu2 %v2435_v63, %s2671_s9 }
 0x21f   : > { %v1163_v33 = vpop.permute.xlu1 %1162  ;;  %v1161_v46 = vpop.permute.xlu0 %1160 }
 0x220   : > { %1236 = vst.msk [vmem:[#allocation2 + $0xb8] sm:$0xff] %vm1212_vm6, %v1163_v33  ;;  %v1506_v4 = vpop.permute.xlu2 %1505  ;;  %v2450_v33 = vld [vmem:[%s2746_s28 + $0x16a] sm:$0xff] }
 0x221   : > { %1235 = vst.msk [vmem:[#allocation2 + $0xb0] sm:$0xff] %vm1212_vm6, %v1161_v46  ;;  %v2406_v46 = vld [vmem:[%s2746_s28 + $0xd9] sm:$0xff] }
 0x225   : > { %1551 = vrot.lane.b32.xlu1 %v2416_v37, %s2670_s8  ;;  %1539 = vrot.lane.b32.xlu0 %v2410_v49, %s2670_s8 }
 0x226   : > { %1732 = vrot.lane.b32.xlu2 %v2442_v29, %s2671_s9 }
 0x227   : > { %v1169_v48 = vpop.permute.xlu1 %1168  ;;  %v1167_v40 = vpop.permute.xlu0 %1166 }
 0x228   : > { %1239 = vst.msk [vmem:[#allocation2 + $0xd0] sm:$0xff] %vm1212_vm6, %v1169_v48  ;;  %v1327_v30 = vpop.permute.xlu2 %1326  ;;  %v2387_v48 = vld [vmem:[%s2746_s28 + $0x170] sm:$0xff] }
 0x229   : > { %1238 = vst.msk [vmem:[#allocation2 + $0xc8] sm:$0xff] %vm1212_vm6, %v1167_v40  ;;  %v2381_v40 = vld [vmem:[%s2746_s28 + $0x128] sm:$0xff] }
 0x22a   : > { %1415 = vst.msk [vmem:[#allocation2 + $0x40] sm:$0xff] %vm1406_vm7, %v1327_v30  ;;  %v2438_v30 = vld [vmem:[%s2746_s28 + $0xda] sm:$0xff] }
 0x22d   : > { %1322 = vrot.lane.b32.xlu1 %v2366_v0, %s2669_s7  ;;  %1744 = vrot.lane.b32.xlu0 %v2448_v3, %s2671_s9 }
 0x22e   : > { %1334 = vrot.lane.b32.xlu2 %v2372_v2, %s2669_s7 }
 0x22f   : > { %v1311_v7 = vpop.permute.xlu1 %1310  ;;  %v1173_v5 = vpop.permute.xlu0 %1172 }
 0x230   : > { %1407 = vst.msk [vmem:[#allocation2] sm:$0xff] %vm1406_vm7, %v1311_v7  ;;  %v1701_v6 = vpop.permute.xlu2 %1700  ;;  %v2419_v7 = vld [vmem:[%s2746_s28 + $0x171] sm:$0xff] }
 0x231   : > { %1241 = vst.msk [vmem:[#allocation2 + $0xe0] sm:$0xff] %vm1212_vm6, %v1173_v5  ;;  %v2413_v5 = vld [vmem:[%s2746_s28 + $0x129] sm:$0xff] }
 0x232   : > { %1600 = vst.msk [vmem:[#allocation2] sm:$0xff] %vm1599_vm8, %v3724_v42  ;;  %v2444_v42 = vld [vmem:[%s2746_s28 + $0x122] sm:$0xff] }
 0x235   : > { %1527 = vrot.lane.b32.xlu1 %v2404_v53, %s2670_s8  ;;  %1515 = vrot.lane.b32.xlu0 %v2398_v10, %s2670_s8 }
 0x236   : > { %1348 = vrot.lane.b32.xlu2 %v2379_v8, %s2669_s7 }
 0x237   : > { %v1313_v9 = vpop.permute.xlu1 %1312  ;;  %v1697_v13 = vpop.permute.xlu0 %1696 }
 0x238   : > { %1408 = vst.msk [vmem:[#allocation2 + $0x8] sm:$0xff] %vm1406_vm7, %v1313_v9  ;;  %v1329_v11 = vpop.permute.xlu2 %1328 }
 0x239   : > { %1793 = vst.msk [vmem:[#allocation2] sm:$0xff] %vm1792_vm9, %v1697_v13 }
 0x23a   : > { %1601 = vst.msk [vmem:[#allocation2 + $0x8] sm:$0xff] %vm1599_vm8, %v1506_v4 }
 0x23b   : > { %1416 = vst.msk [vmem:[#allocation2 + $0x48] sm:$0xff] %vm1406_vm7, %v1329_v11  ;;  %v2375_v11 = vld [vmem:[%s2746_s28 + $0xe0] sm:$0xff] }
 0x23d   : > { %1708 = vrot.lane.b32.xlu1 %v2430_v12, %s2671_s9  ;;  %1360 = vrot.lane.b32.xlu0 %v2385_v16, %s2669_s7  ;;  %v2451_v12 = vld [vmem:[%s2746_s28 + $0x172] sm:$0xff]  ;;  %v2407_v16 = vld [vmem:[%s2746_s28 + $0xe1] sm:$0xff] }
 0x23e   : > { %1720 = vrot.lane.b32.xlu2 %v2436_v14, %s2671_s9 }
 0x23f   : > { %v1315_v15 = vpop.permute.xlu1 %1314  ;;  %v1699_v19 = vpop.permute.xlu0 %1698 }
 0x240   : > { %1409 = vst.msk [vmem:[#allocation2 + $0x10] sm:$0xff] %vm1406_vm7, %v1315_v15  ;;  %v1825_v17 = vld [vmem:[#allocation2] sm:$0xff]  ;;  %v1343_v18 = vpop.permute.xlu2 %1342 }
 0x241   : > { %1794 = vst.msk [vmem:[#allocation2 + $0x8] sm:$0xff] %vm1792_vm9, %v1699_v19  ;;  %1889 = vmatmul.f32.vlgmr.msra.gmra.mxu0 %v1825_v17 }
 0x242   : > { %1423 = vst.msk [vmem:[#allocation2 + $0x80] sm:$0xff] %vm1406_vm7, %v1343_v18  ;;  %v2382_v18 = vld [vmem:[%s2746_s28 + $0x138] sm:$0xff] }
 0x245   : > { %1553 = vrot.lane.b32.xlu1 %v2417_v22, %s2670_s8  ;;  %1541 = vrot.lane.b32.xlu0 %v2411_v20, %s2670_s8  ;;  %v2388_v22 = vld [vmem:[%s2746_s28 + $0x180] sm:$0xff] }
 0x246   : > { %1734 = vrot.lane.b32.xlu2 %v2443_v21, %s2671_s9  ;;  %v2439_v20 = vld [vmem:[%s2746_s28 + $0xe2] sm:$0xff] }
 0x247   : > { %v1520_v23 = vpop.permute.xlu1 %1519  ;;  %v1508_v25 = vpop.permute.xlu0 %1507 }
 0x248   : > { %1608 = vst.msk [vmem:[#allocation2 + $0x40] sm:$0xff] %vm1599_vm8, %v1520_v23  ;;  %v1826_v24 = vld [vmem:[#allocation2 + $0x8] sm:$0xff]  ;;  %v1536_v55 = vpop.permute.xlu2 %1535 }
 0x249   : > { %1602 = vst.msk [vmem:[#allocation2 + $0x10] sm:$0xff] %vm1599_vm8, %v1508_v25  ;;  %1892 = vmatmul.f32.gmra.mxu0 %v1826_v24 }
 0x24a   : > { %1795 = vst.msk [vmem:[#allocation2 + $0x10] sm:$0xff] %vm1792_vm9, %v1701_v6  ;;  %v2445_v6 = vld [vmem:[%s2746_s28 + $0x12a] sm:$0xff] }
 0x24b   : > { %1616 = vst.msk [vmem:[#allocation2 + $0x80] sm:$0xff] %vm1599_vm8, %v1536_v55  ;;  %v2414_v55 = vld [vmem:[%s2746_s28 + $0x139] sm:$0xff] }
 0x24d   : > { %1324 = vrot.lane.b32.xlu1 %v2367_v28, %s2669_s7  ;;  %1746 = vrot.lane.b32.xlu0 %v2449_v26, %s2671_s9  ;;  %v2420_v28 = vld [vmem:[%s2746_s28 + $0x181] sm:$0xff] }
 0x24e   : > { %1336 = vrot.lane.b32.xlu2 %v2373_v54, %s2669_s7  ;;  %v2446_v26 = vld [vmem:[%s2746_s28 + $0x13a] sm:$0xff] }
 0x24f   : > { %v1317_v58 = vpop.permute.xlu1 %1316  ;;  %v1713_v27 = vpop.permute.xlu0 %1712 }
 0x250   : > { %1410 = vst.msk [vmem:[#allocation2 + $0x18] sm:$0xff] %vm1406_vm7, %v1317_v58  ;;  %v1331_v61 = vpop.permute.xlu2 %1330 }
 0x251   : > { %1801 = vst.msk [vmem:[#allocation2 + $0x40] sm:$0xff] %vm1792_vm9, %v1713_v27  ;;  %v1827_v31 = vld [vmem:[#allocation2 + $0x10] sm:$0xff] }
 0x252   : > { %1895 = vmatmul.f32.gmra.mxu0 %v1827_v31  ;;  %1417 = vst.msk [vmem:[#allocation2 + $0x50] sm:$0xff] %vm1406_vm7, %v1331_v61  ;;  %v2452_v61 = vld [vmem:[%s2746_s28 + $0x182] sm:$0xff] }
 0x255   : > { %1529 = vrot.lane.b32.xlu1 %v2405_v35, %s2670_s8  ;;  %1517 = vrot.lane.b32.xlu0 %v2399_v1, %s2670_s8  ;;  %v2383_v35 = vld [vmem:[%s2746_s28 + $0x140] sm:$0xff] }
 0x256   : > { %1350 = vrot.lane.b32.xlu2 %v2380_v43, %s2669_s7 }
 0x257   : > { %v1522_v51 = vpop.permute.xlu1 %1521  ;;  %v1510_v38 = vpop.permute.xlu0 %1509 }
 0x258   : > { %1609 = vst.msk [vmem:[#allocation2 + $0x48] sm:$0xff] %vm1599_vm8, %v1522_v51  ;;  %v1833_v47 = vld [vmem:[#allocation2 + $0x40] sm:$0xff]  ;;  %v1345_v50 = vpop.permute.xlu2 %1344 }
 0x259   : > { %1603 = vst.msk [vmem:[#allocation2 + $0x18] sm:$0xff] %vm1599_vm8, %v1510_v38  ;;  %1913 = vmatmul.f32.vlgmr.msra.gmra.mxu1 %v1833_v47  ;;  %v2389_v47 = vld [vmem:[%s2746_s28 + $0x188] sm:$0xff] }
 0x25a   : > { %1424 = vst.msk [vmem:[#allocation2 + $0x88] sm:$0xff] %vm1406_vm7, %v1345_v50  ;;  %v2415_v50 = vld [vmem:[%s2746_s28 + $0x141] sm:$0xff] }
 0x25d   : > { %1710 = vrot.lane.b32.xlu1 %v2431_v44, %s2671_s9  ;;  %1362 = vrot.lane.b32.xlu0 %v2386_v57, %s2669_s7  ;;  %v2421_v44 = vld [vmem:[%s2746_s28 + $0x189] sm:$0xff] }
 0x25e   : > { %1722 = vrot.lane.b32.xlu2 %v2437_v34, %s2671_s9 }
 0x25f   : > { %v1715_v36 = vpop.permute.xlu1 %1714  ;;  %v1703_v32 = vpop.permute.xlu0 %1702 }
 0x260   : > { %1802 = vst.msk [vmem:[#allocation2 + $0x48] sm:$0xff] %vm1792_vm9, %v1715_v36  ;;  %v1538_v60 = vpop.permute.xlu2 %1537 }
 0x261   : > { %1796 = vst.msk [vmem:[#allocation2 + $0x18] sm:$0xff] %vm1792_vm9, %v1703_v32 }
 0x262   : > { %1617 = vst.msk [vmem:[#allocation2 + $0x88] sm:$0xff] %vm1599_vm8, %v1538_v60  ;;  %v2447_v60 = vld [vmem:[%s2746_s28 + $0x142] sm:$0xff] }
 0x265   : > { %1555 = vrot.lane.b32.xlu1 %v2418_v45, %s2670_s8  ;;  %1543 = vrot.lane.b32.xlu0 %v2412_v62, %s2670_s8  ;;  %v2453_v45 = vld [vmem:[%s2746_s28 + $0x18a] sm:$0xff] }
 0x266   : > { %1736 = vrot.lane.b32.xlu2 %v2444_v42, %s2671_s9 }
 0x267   : > { %v1319_v59 = vpop.permute.xlu1 %1318  ;;  %v1729_v52 = vpop.permute.xlu0 %1728  ;;  %v1834_v41 = vld [vmem:[#allocation2 + $0x48] sm:$0xff] }
 0x268   : > { %1411 = vst.msk [vmem:[#allocation2 + $0x20] sm:$0xff] %vm1406_vm7, %v1319_v59  ;;  %v1828_v56 = vld [vmem:[#allocation2 + $0x18] sm:$0xff]  ;;  %1916 = vmatmul.f32.gmra.mxu1 %v1834_v41  ;;  %v1333_v63 = vpop.permute.xlu2 %1332 }
 0x269   : > { %1809 = vst.msk [vmem:[#allocation2 + $0x80] sm:$0xff] %vm1792_vm9, %v1729_v52  ;;  %1898 = vmatmul.f32.gmra.mxu0 %v1828_v56  ;;  %v2390_v41 = vld [vmem:[%s2746_s28 + $0x198] sm:$0xff] }
 0x26a   : > { %1418 = vst.msk [vmem:[#allocation2 + $0x58] sm:$0xff] %vm1406_vm7, %v1333_v63  ;;  %v2422_v56 = vld [vmem:[%s2746_s28 + $0x199] sm:$0xff] }
 0x26b   : > { %v2454_v63 = vld [vmem:[%s2746_s28 + $0x19a] sm:$0xff] }
 0x26d   : > { %1338 = vrot.lane.b32.xlu1 %v2374_v39, %s2669_s7  ;;  %1748 = vrot.lane.b32.xlu0 %v2450_v33, %s2671_s9 }
 0x26e   : > { %1531 = vrot.lane.b32.xlu2 %v2406_v46, %s2670_s8 }
 0x26f   : > { %v1524_v4 = vpop.permute.xlu1 %1523  ;;  %v1512_v37 = vpop.permute.xlu0 %1511 }
 0x270   : > { %1610 = vst.msk [vmem:[#allocation2 + $0x50] sm:$0xff] %vm1599_vm8, %v1524_v4  ;;  %v1841_v49 = vld [vmem:[#allocation2 + $0x80] sm:$0xff]  ;;  %v1347_v29 = vpop.permute.xlu2 %1346 }
 0x271   : > { %1604 = vst.msk [vmem:[#allocation2 + $0x20] sm:$0xff] %vm1599_vm8, %v1512_v37  ;;  %1937 = vmatmul.f32.vlgmr.msra.gmra.mxu2 %v1841_v49  ;;  %v2391_v37 = vld [vmem:[%s2746_s28 + $0x1a0] sm:$0xff] }
 0x272   : > { %1425 = vst.msk [vmem:[#allocation2 + $0x90] sm:$0xff] %vm1406_vm7, %v1347_v29  ;;  %v2423_v49 = vld [vmem:[%s2746_s28 + $0x1a1] sm:$0xff] }
 0x275   : > { %1364 = vrot.lane.b32.xlu1 %v2387_v48, %s2669_s7  ;;  %1352 = vrot.lane.b32.xlu0 %v2381_v40, %s2669_s7 }
 0x276   : > { %1724 = vrot.lane.b32.xlu2 %v2438_v30, %s2671_s9 }
 0x277   : > { %v1717_v0 = vpop.permute.xlu1 %1716  ;;  %v1705_v3 = vpop.permute.xlu0 %1704 }
 0x278   : > { %1803 = vst.msk [vmem:[#allocation2 + $0x50] sm:$0xff] %vm1792_vm9, %v1717_v0  ;;  %v1719_v2 = vpop.permute.xlu2 %1718 }
 0x279   : > { %1797 = vst.msk [vmem:[#allocation2 + $0x20] sm:$0xff] %vm1792_vm9, %v1705_v3  ;;  %v2455_v3 = vld [vmem:[%s2746_s28 + $0x1a2] sm:$0xff]  ;;  %s2463_s28 = sshll.u32 %s2714_s16, 8 }
 0x27d   : > { %1557 = vrot.lane.b32.xlu1 %v2419_v7, %s2670_s8  ;;  %1545 = vrot.lane.b32.xlu0 %v2413_v5, %s2670_s8 }
 0x27e   : > { %1738 = vrot.lane.b32.xlu2 %v2445_v6, %s2671_s9 }
 0x27f   : > { %v1321_v53 = vpop.permute.xlu1 %1320  ;;  %v1731_v10 = vpop.permute.xlu0 %1730  ;;  %v1835_v8 = vld [vmem:[#allocation2 + $0x50] sm:$0xff] }
 0x280   : > { %1412 = vst.msk [vmem:[#allocation2 + $0x28] sm:$0xff] %vm1406_vm7, %v1321_v53  ;;  %v1829_v9 = vld [vmem:[#allocation2 + $0x20] sm:$0xff]  ;;  %1919 = vmatmul.f32.gmra.mxu1 %v1835_v8  ;;  %v1733_v13 = vpop.permute.xlu2 %1732 }
 0x281   : > { %1810 = vst.msk [vmem:[#allocation2 + $0x88] sm:$0xff] %vm1792_vm9, %v1731_v10  ;;  %1901 = vmatmul.f32.gmra.mxu0 %v1829_v9 }
 0x285   : > { %1340 = vrot.lane.b32.xlu1 %v2375_v11, %s2669_s7  ;;  %1750 = vrot.lane.b32.xlu0 %v2451_v12, %s2671_s9 }
 0x286   : > { %1533 = vrot.lane.b32.xlu2 %v2407_v16, %s2670_s8 }
 0x287   : > { %v1526_v14 = vpop.permute.xlu1 %1525  ;;  %v1514_v15 = vpop.permute.xlu0 %1513 }
 0x288   : > { %1611 = vst.msk [vmem:[#allocation2 + $0x58] sm:$0xff] %vm1599_vm8, %v1526_v14  ;;  %v1842_v19 = vld [vmem:[#allocation2 + $0x88] sm:$0xff]  ;;  %v1335_v17 = vpop.permute.xlu2 %1334 }
 0x289   : > { %1605 = vst.msk [vmem:[#allocation2 + $0x28] sm:$0xff] %vm1599_vm8, %v1514_v15  ;;  %1940 = vmatmul.f32.gmra.mxu2 %v1842_v19 }
 0x28a   : > { %1804 = vst.msk [vmem:[#allocation2 + $0x58] sm:$0xff] %vm1792_vm9, %v1719_v2 }
 0x28b   : > { %1419 = vst.msk [vmem:[#allocation2 + $0x60] sm:$0xff] %vm1406_vm7, %v1335_v17 }
 0x28d   : > { %1354 = vrot.lane.b32.xlu0 %v2382_v18, %s2669_s7  ;;  %1366 = vrot.lane.b32.xlu1 %v2388_v22, %s2669_s7 }
 0x28e   : > { %1726 = vrot.lane.b32.xlu2 %v2439_v20, %s2671_s9 }
 0x28f   : > { %v1707_v21 = vpop.permute.xlu1 %1706  ;;  %v1359_v23 = vpop.permute.xlu0 %1358 }
 0x290   : > { %1798 = vst.msk [vmem:[#allocation2 + $0x28] sm:$0xff] %vm1792_vm9, %v1707_v21  ;;  %v1349_v24 = vpop.permute.xlu2 %1348 }
 0x291   : > { %1431 = vst.msk [vmem:[#allocation2 + $0xc0] sm:$0xff] %vm1406_vm7, %v1359_v23  ;;  %v1836_v25 = vld [vmem:[#allocation2 + $0x58] sm:$0xff] }
 0x292   : > { %1922 = vmatmul.f32.gmra.mxu1 %v1836_v25  ;;  %1426 = vst.msk [vmem:[#allocation2 + $0x98] sm:$0xff] %vm1406_vm7, %v1349_v24 }
 0x295   : > { %1547 = vrot.lane.b32.xlu0 %v2414_v55, %s2670_s8  ;;  %1559 = vrot.lane.b32.xlu1 %v2420_v28, %s2670_s8 }
 0x296   : > { %1740 = vrot.lane.b32.xlu2 %v2446_v26, %s2671_s9 }
 0x297   : > { %v1552_v54 = vpop.permute.xlu1 %1551  ;;  %v1540_v58 = vpop.permute.xlu0 %1539  ;;  %v1830_v27 = vld [vmem:[#allocation2 + $0x28] sm:$0xff] }
 0x298   : > { %1624 = vst.msk [vmem:[#allocation2 + $0xc0] sm:$0xff] %vm1599_vm8, %v1552_v54  ;;  %1904 = vmatmul.f32.gmra.mxu0 %v1830_v27  ;;  %v1721_v31 = vpop.permute.xlu2 %1720 }
 0x299   : > { %1618 = vst.msk [vmem:[#allocation2 + $0x90] sm:$0xff] %vm1599_vm8, %v1540_v58 }
 0x29a   : > { %1811 = vst.msk [vmem:[#allocation2 + $0x90] sm:$0xff] %vm1792_vm9, %v1733_v13 }
 0x29d   : > { %1752 = vrot.lane.b32.xlu0 %v2452_v61, %s2671_s9  ;;  %1174 = vrot.lane.b32.xlu1 %v2451_v12, %s2668_s6 }
 0x29e   : > { %1356 = vrot.lane.b32.xlu2 %v2383_v35, %s2669_s7 }
 0x29f   : > { %v1323_v1 = vpop.permute.xlu1 %1322  ;;  %v1745_v43 = vpop.permute.xlu0 %1744 }
 0x2a0   : > { %1413 = vst.msk [vmem:[#allocation2 + $0x30] sm:$0xff] %vm1406_vm7, %v1323_v1  ;;  %v1735_v38 = vpop.permute.xlu2 %1734 }
 0x2a1   : > { %1817 = vst.msk [vmem:[#allocation2 + $0xc0] sm:$0xff] %vm1792_vm9, %v1745_v43  ;;  %v1843_v51 = vld [vmem:[#allocation2 + $0x90] sm:$0xff] }
 0x2a2   : > { %1943 = vmatmul.f32.gmra.mxu2 %v1843_v51 }
 0x2a5   : > { %1368 = vrot.lane.b32.xlu0 %v2389_v47, %s2669_s7  ;;  %1549 = vrot.lane.b32.xlu1 %v2415_v50, %s2670_s8 }
 0x2a6   : > { %1561 = vrot.lane.b32.xlu2 %v2421_v44, %s2670_s8 }
 0x2a7   : > { %v1528_v57 = vpop.permute.xlu1 %1527  ;;  %v1516_v34 = vpop.permute.xlu0 %1515 }
 0x2a8   : > { %1612 = vst.msk [vmem:[#allocation2 + $0x60] sm:$0xff] %vm1599_vm8, %v1528_v57  ;;  %v1849_v36 = vld [vmem:[#allocation2 + $0xc0] sm:$0xff]  ;;  %v1337_v32 = vpop.permute.xlu2 %1336 }
 0x2a9   : > { %1606 = vst.msk [vmem:[#allocation2 + $0x30] sm:$0xff] %vm1599_vm8, %v1516_v34  ;;  %1961 = vmatmul.f32.vlgmr.msra.gmra.mxu3 %v1849_v36 }
 0x2aa   : > { %1805 = vst.msk [vmem:[#allocation2 + $0x60] sm:$0xff] %vm1792_vm9, %v1721_v31 }
 0x2ab   : > { %1420 = vst.msk [vmem:[#allocation2 + $0x68] sm:$0xff] %vm1406_vm7, %v1337_v32 }
 0x2ad   : > { %1742 = vrot.lane.b32.xlu0 %v2447_v60, %s2671_s9  ;;  %1754 = vrot.lane.b32.xlu1 %v2453_v45, %s2671_s9 }
 0x2ae   : > { %1176 = vrot.lane.b32.xlu2 %v2452_v61, %s2668_s6 }
 0x2af   : > { %v1709_v62 = vpop.permute.xlu1 %1708  ;;  %v1361_v42 = vpop.permute.xlu0 %1360 }
 0x2b0   : > { %1799 = vst.msk [vmem:[#allocation2 + $0x30] sm:$0xff] %vm1792_vm9, %v1709_v62  ;;  %v1351_v52 = vpop.permute.xlu2 %1350 }
 0x2b1   : > { %1432 = vst.msk [vmem:[#allocation2 + $0xc8] sm:$0xff] %vm1406_vm7, %v1361_v42  ;;  %v1837_v59 = vld [vmem:[#allocation2 + $0x60] sm:$0xff] }
 0x2b2   : > { %1925 = vmatmul.f32.gmra.mxu1 %v1837_v59  ;;  %1427 = vst.msk [vmem:[#allocation2 + $0xa0] sm:$0xff] %vm1406_vm7, %v1351_v52 }
 0x2b5   : > { %1370 = vrot.lane.b32.xlu0 %v2390_v41, %s2669_s7  ;;  %1563 = vrot.lane.b32.xlu1 %v2422_v56, %s2670_s8 }
 0x2b6   : > { %1756 = vrot.lane.b32.xlu2 %v2454_v63, %s2671_s9 }
 0x2b7   : > { %v1554_v39 = vpop.permute.xlu1 %1553  ;;  %v1542_v33 = vpop.permute.xlu0 %1541  ;;  %v1831_v46 = vld [vmem:[#allocation2 + $0x30] sm:$0xff] }
 0x2b8   : > { %1625 = vst.msk [vmem:[#allocation2 + $0xc8] sm:$0xff] %vm1599_vm8, %v1554_v39  ;;  %1907 = vmatmul.f32.gmra.mxu0 %v1831_v46  ;;  %v1723_v4 = vpop.permute.xlu2 %1722 }
 0x2b9   : > { %1619 = vst.msk [vmem:[#allocation2 + $0x98] sm:$0xff] %vm1599_vm8, %v1542_v33 }
 0x2ba   : > { %1812 = vst.msk [vmem:[#allocation2 + $0x98] sm:$0xff] %vm1792_vm9, %v1735_v38 }
 0x2bd   : > { %1178 = vrot.lane.b32.xlu0 %v2453_v45, %s2668_s6  ;;  %1372 = vrot.lane.b32.xlu1 %v2391_v37, %s2669_s7 }
 0x2be   : > { %v1890_v29 = vpop.f32.mrf.mxu0  ;;  %1565 = vrot.lane.b32.xlu2 %v2423_v49, %s2670_s8  ;;  %s2144_s8 = scalar_lea.hbm %s4115_s2, %s2463_s28 }
 0x2bf   : > { %1986 = vst [vmem:[%s3928_s4] sm:$0xff] %v1890_v29  ;;  %v1325_v48 = vpop.permute.xlu1 %1324  ;;  %v1747_v40 = vpop.permute.xlu0 %1746  ;;  %v2055_v7 = vmul.f32 %v1890_v29, %v1890_v29  ;;  %s2147_s5 = sshll.u32 %s2144_s8, 4  ;;  %s2148_s5 = int_to_ptr.hbm [resolvable:$true] %s2147_s5 }
 0x2c0   : > { %1414 = vst.msk [vmem:[#allocation2 + $0x38] sm:$0xff] %vm1406_vm7, %v1325_v48  ;;  %v1737_v0 = vpop.permute.xlu2 %1736  ;;  %s2581_s11 = sshra.s32 %s2148_s5, 4  ;;  %s2582_s11 = int_to_ptr.hbm [resolvable:$true] %s2581_s11 }
 0x2c1   : > { %1818 = vst.msk [vmem:[#allocation2 + $0xc8] sm:$0xff] %vm1792_vm9, %v1747_v40  ;;  %v1844_v30 = vld [vmem:[#allocation2 + $0x98] sm:$0xff]  ;;  %s2583_s17 = scalar_lea.hbm %s2582_s11, 256  ;;  %p2588_p0 = scmp.lt.s32.totalorder %s2582_s11, %s4115_s2 }
 0x2c2   : > { %1946 = vmatmul.f32.gmra.mxu2 %v1844_v30  ;;  %p2584_p11 = scmp.ne.s32.totalorder %s2582_s11, %s2583_s17  ;;  %p2589_p1 = scmp.lt.s32.totalorder %s2587_s24, %s2583_s17 }
 0x2c4   : > { %p2585_p12 = pnand %p2584_p11, %p2731_p5  ;;  %p2590_p2 = por %p2589_p1, %p2588_p0 }
 0x2c5   : > { %1758 = vrot.lane.b32.xlu0 %v2455_v3, %s2671_s9  ;;  %s2145_s9 = sshll.u32 %s3928_s4, 4  ;;  %s2146_s9 = int_to_ptr.vmem [resolvable:$true] %s2145_s9 }
 0x2c6   : > { %v1893_v2 = vpop.f32.mrf.mxu0  ;;  %p2586_p13 = pneg %p2585_p12 }
 0x2c7   : > { %1987 = vst [vmem:[%s3928_s4 + $0x8] sm:$0xff] %v1893_v2  ;;  %v2018_v5 = vadd.f32 %v1893_v2, %v1890_v29  ;;  %v2056_v6 = vmul.f32 %v1893_v2, %v1893_v2  ;;  %v1530_v53 = vpop.permute.xlu1 %1529  ;;  %v1518_v10 = vpop.permute.xlu0 %1517 }
 0x2c8   : > { %1613 = vst.msk [vmem:[#allocation2 + $0x68] sm:$0xff] %vm1599_vm8, %v1530_v53  ;;  %v1850_v8 = vld [vmem:[#allocation2 + $0xc8] sm:$0xff]  ;;  %v1532_v13 = vpop.permute.xlu2 %1531  ;;  %p2591_p3 = pnand %p2590_p2, %p2586_p13 }
 0x2c9   : > { %v2087_v9 = vadd.f32 %v2056_v6, %v2055_v7  ;;  %1607 = vst.msk [vmem:[#allocation2 + $0x38] sm:$0xff] %vm1599_vm8, %v1518_v10  ;;  %1964 = vmatmul.f32.gmra.mxu3 %v1850_v8 }
 0x2ca   : > { %1806 = vst.msk [vmem:[#allocation2 + $0x68] sm:$0xff] %vm1792_vm9, %v1723_v4 }
 0x2cf   : > { %v1896_v11 = vpop.f32.mrf.mxu0  ;;  %v1711_v12 = vpop.permute.xlu1 %1710 }
 0x2d0   : > { %1988 = vst [vmem:[%s3928_s4 + $0x10] sm:$0xff] %v1896_v11  ;;  %v2019_v16 = vadd.f32 %v2018_v5, %v1896_v11  ;;  %v2057_v14 = vmul.f32 %v1896_v11, %v1896_v11  ;;  %v1363_v15 = vpop.permute.xlu0 %1362  ;;  %v1725_v17 = vpop.permute.xlu2 %1724 }
 0x2d1   : > { %1800 = vst.msk [vmem:[#allocation2 + $0x38] sm:$0xff] %vm1792_vm9, %v1711_v12  ;;  %v1838_v19 = vld [vmem:[#allocation2 + $0x68] sm:$0xff] }
 0x2d2   : > { %v2088_v18 = vadd.f32 %v2087_v9, %v2057_v14  ;;  %1433 = vst.msk [vmem:[#allocation2 + $0xd0] sm:$0xff] %vm1406_vm7, %v1363_v15  ;;  %1928 = vmatmul.f32.gmra.mxu1 %v1838_v19 }
 0x2d6   : > { %v3943_v22 = vpop.f32.mrf.mxu1 }
 0x2d7   : > { %1994 = vst [vmem:[%s3928_s4 + $0x40] sm:$0xff] %v3943_v22  ;;  %v1556_v20 = vpop.permute.xlu1 %1555 }
 0x2d8   : > { %1626 = vst.msk [vmem:[#allocation2 + $0xd0] sm:$0xff] %vm1599_vm8, %v1556_v20  ;;  %v1544_v21 = vpop.permute.xlu0 %1543  ;;  %v1832_v23 = vld [vmem:[#allocation2 + $0x38] sm:$0xff]  ;;  %v1739_v25 = vpop.permute.xlu2 %1738 }
 0x2d9   : > { %1620 = vst.msk [vmem:[#allocation2 + $0xa0] sm:$0xff] %vm1599_vm8, %v1544_v21  ;;  %1910 = vmatmul.f32.gmra.mxu0 %v1832_v23 }
 0x2da   : > { %1813 = vst.msk [vmem:[#allocation2 + $0xa0] sm:$0xff] %vm1792_vm9, %v1737_v0 }
 0x2df   : > { %v1339_v24 = vpop.permute.xlu1 %1338 }
 0x2e0   : > { %1421 = vst.msk [vmem:[#allocation2 + $0x70] sm:$0xff] %vm1406_vm7, %v1339_v24  ;;  %v1749_v55 = vpop.permute.xlu0 %1748  ;;  %v1534_v26 = vpop.permute.xlu2 %1533 }
 0x2e1   : > { %1614 = vst.msk [vmem:[#allocation2 + $0x70] sm:$0xff] %vm1599_vm8, %v1532_v13  ;;  %v1845_v28 = vld [vmem:[#allocation2 + $0xa0] sm:$0xff] }
 0x2e2   : > { %1819 = vst.msk [vmem:[#allocation2 + $0xd0] sm:$0xff] %vm1792_vm9, %v1749_v55  ;;  %1949 = vmatmul.f32.gmra.mxu2 %v1845_v28 }
 0x2e3   : > { %1807 = vst.msk [vmem:[#allocation2 + $0x70] sm:$0xff] %vm1792_vm9, %v1725_v17 }
 0x2e5   : > { %v3954_v54 = vpop.f32.mrf.mxu1 }
 0x2e6   : > { %v1899_v58 = vpop.f32.mrf.mxu0  ;;  %1995 = vst [vmem:[%s3928_s4 + $0x48] sm:$0xff] %v3954_v54 }
 0x2e7   : > { %1989 = vst [vmem:[%s3928_s4 + $0x18] sm:$0xff] %v1899_v58  ;;  %v2020_v27 = vadd.f32 %v2019_v16, %v1899_v58  ;;  %v2058_v31 = vmul.f32 %v1899_v58, %v1899_v58  ;;  %v1365_v61 = vpop.permute.xlu1 %1364 }
 0x2e8   : > { %1434 = vst.msk [vmem:[#allocation2 + $0xd8] sm:$0xff] %vm1406_vm7, %v1365_v61  ;;  %v1353_v35 = vpop.permute.xlu0 %1352  ;;  %v1727_v51 = vpop.permute.xlu2 %1726 }
 0x2e9   : > { %v2089_v1 = vadd.f32 %v2088_v18, %v2058_v31  ;;  %1428 = vst.msk [vmem:[#allocation2 + $0xa8] sm:$0xff] %vm1406_vm7, %v1353_v35  ;;  %v1851_v43 = vld [vmem:[#allocation2 + $0xd0] sm:$0xff] }
 0x2ea   : > { %1967 = vmatmul.f32.gmra.mxu3 %v1851_v43  ;;  %v1839_v38 = vld [vmem:[#allocation2 + $0x70] sm:$0xff]  ;;  %v2063_v43 = vmul.f32 %v3943_v22, %v3943_v22 }
 0x2eb   : > { %1931 = vmatmul.f32.gmra.mxu1 %v1839_v38 }
 0x2ef   : > { %v1558_v47 = vpop.permute.xlu1 %1557 }
 0x2f0   : > { %1627 = vst.msk [vmem:[#allocation2 + $0xd8] sm:$0xff] %vm1599_vm8, %v1558_v47  ;;  %v1546_v50 = vpop.permute.xlu0 %1545  ;;  %v1741_v44 = vpop.permute.xlu2 %1740  ;;  %v2064_v47 = vmul.f32 %v3954_v54, %v3954_v54 }
 0x2f1   : > { %1621 = vst.msk [vmem:[#allocation2 + $0xa8] sm:$0xff] %vm1599_vm8, %v1546_v50 }
 0x2f2   : > { %1814 = vst.msk [vmem:[#allocation2 + $0xa8] sm:$0xff] %vm1792_vm9, %v1739_v25 }
 0x2f4   : > { %v3964_v57 = vpop.f32.mrf.mxu2 }
 0x2f5   : > { %2002 = vst [vmem:[%s3928_s4 + $0x80] sm:$0xff] %v3964_v57 }
 0x2f7   : > { %v1341_v34 = vpop.permute.xlu1 %1340 }
 0x2f8   : > { %1422 = vst.msk [vmem:[#allocation2 + $0x78] sm:$0xff] %vm1406_vm7, %v1341_v34  ;;  %v1751_v36 = vpop.permute.xlu0 %1750  ;;  %v1357_v60 = vpop.permute.xlu2 %1356 }
 0x2f9   : > { %1615 = vst.msk [vmem:[#allocation2 + $0x78] sm:$0xff] %vm1599_vm8, %v1534_v26  ;;  %v1846_v32 = vld [vmem:[#allocation2 + $0xa8] sm:$0xff] }
 0x2fa   : > { %1820 = vst.msk [vmem:[#allocation2 + $0xd8] sm:$0xff] %vm1792_vm9, %v1751_v36  ;;  %1952 = vmatmul.f32.gmra.mxu2 %v1846_v32 }
 0x2fb   : > { %1808 = vst.msk [vmem:[#allocation2 + $0x78] sm:$0xff] %vm1792_vm9, %v1727_v51 }
 0x2fc   : > { %1430 = vst.msk [vmem:[#allocation2 + $0xb8] sm:$0xff] %vm1406_vm7, %v1357_v60 }
 0x2fd   : > { %v3973_v45 = vpop.f32.mrf.mxu1 }
 0x2fe   : > { %v1902_v62 = vpop.f32.mrf.mxu0  ;;  %1996 = vst [vmem:[%s3928_s4 + $0x50] sm:$0xff] %v3973_v45  ;;  %v2065_v34 = vmul.f32 %v3973_v45, %v3973_v45 }
 0x2ff   : > { %1990 = vst [vmem:[%s3928_s4 + $0x20] sm:$0xff] %v1902_v62  ;;  %v2021_v42 = vadd.f32 %v2020_v27, %v1902_v62  ;;  %v2059_v59 = vmul.f32 %v1902_v62, %v1902_v62  ;;  %v1367_v52 = vpop.permute.xlu1 %1366 }
 0x300   : > { %v1355_v41 = vpop.permute.xlu0 %1354  ;;  %1435 = vst.msk [vmem:[#allocation2 + $0xe0] sm:$0xff] %vm1406_vm7, %v1367_v52  ;;  %v1562_v39 = vpop.permute.xlu2 %1561 }
 0x301   : > { %v2090_v56 = vadd.f32 %v2089_v1, %v2059_v59  ;;  %1429 = vst.msk [vmem:[#allocation2 + $0xb0] sm:$0xff] %vm1406_vm7, %v1355_v41  ;;  %v1852_v63 = vld [vmem:[#allocation2 + $0xd8] sm:$0xff] }
 0x302   : > { %1970 = vmatmul.f32.gmra.mxu3 %v1852_v63  ;;  %v1840_v33 = vld [vmem:[#allocation2 + $0x78] sm:$0xff] }
 0x303   : > { %1934 = vmatmul.f32.gmra.mxu1 %v1840_v33 }
 0x307   : > { %v1560_v46 = vpop.permute.xlu1 %1559 }
 0x308   : > { %v1548_v4 = vpop.permute.xlu0 %1547  ;;  %1628 = vst.msk [vmem:[#allocation2 + $0xe0] sm:$0xff] %vm1599_vm8, %v1560_v46  ;;  %v1177_v37 = vpop.permute.xlu2 %1176 }
 0x309   : > { %1622 = vst.msk [vmem:[#allocation2 + $0xb0] sm:$0xff] %vm1599_vm8, %v1548_v4 }
 0x30a   : > { %1815 = vst.msk [vmem:[#allocation2 + $0xb0] sm:$0xff] %vm1792_vm9, %v1741_v44 }
 0x30b   : > { %1243 = vst.msk [vmem:[#allocation2 + $0xf0] sm:$0xff] %vm1212_vm6, %v1177_v37 }
 0x30c   : > { %v3984_v49 = vpop.f32.mrf.mxu2 }
 0x30d   : > { %2003 = vst [vmem:[%s3928_s4 + $0x88] sm:$0xff] %v3984_v49 }
 0x30f   : > { %v1175_v29 = vpop.permute.xlu1 %1174  ;;  %v3988_v48 = vpop.f32.mrf.mxu1 }
 0x310   : > { %v1753_v40 = vpop.permute.xlu0 %1752  ;;  %1242 = vst.msk [vmem:[#allocation2 + $0xe8] sm:$0xff] %vm1212_vm6, %v1175_v29  ;;  %v1757_v13 = vpop.permute.xlu2 %1756  ;;  %v2066_v60 = vmul.f32 %v3988_v48, %v3988_v48 }
 0x311   : > { %1821 = vst.msk [vmem:[#allocation2 + $0xe0] sm:$0xff] %vm1792_vm9, %v1753_v40  ;;  %v1847_v30 = vld [vmem:[#allocation2 + $0xb0] sm:$0xff] }
 0x312   : > { %1955 = vmatmul.f32.gmra.mxu2 %v1847_v30  ;;  %1997 = vst [vmem:[%s3928_s4 + $0x58] sm:$0xff] %v3988_v48 }
 0x315   : > { %v1905_v0 = vpop.f32.mrf.mxu0 }
 0x316   : > { %1991 = vst [vmem:[%s3928_s4 + $0x28] sm:$0xff] %v1905_v0  ;;  %v2022_v3 = vadd.f32 %v2021_v42, %v1905_v0  ;;  %v2060_v2 = vmul.f32 %v1905_v0, %v1905_v0  ;;  %v2071_v0 = vmul.f32 %v3964_v57, %v3964_v57 }
 0x317   : > { %v1550_v7 = vpop.permute.xlu1 %1549 }
 0x318   : > { %v2091_v5 = vadd.f32 %v2090_v56, %v2060_v2  ;;  %v1369_v6 = vpop.permute.xlu0 %1368  ;;  %v1853_v53 = vld [vmem:[#allocation2 + $0xe0] sm:$0xff]  ;;  %1623 = vst.msk [vmem:[#allocation2 + $0xb8] sm:$0xff] %vm1599_vm8, %v1550_v7  ;;  %v1566_v20 = vpop.permute.xlu2 %1565  ;;  %v2072_v7 = vmul.f32 %v3984_v49, %v3984_v49 }
 0x319   : > { %1436 = vst.msk [vmem:[#allocation2 + $0xe8] sm:$0xff] %vm1406_vm7, %v1369_v6  ;;  %1973 = vmatmul.f32.gmra.mxu3 %v1853_v53 }
 0x31a   : > { %1629 = vst.msk [vmem:[#allocation2 + $0xe8] sm:$0xff] %vm1599_vm8, %v1562_v39 }
 0x31f   : > { %v1755_v10 = vpop.permute.xlu1 %1754 }
 0x320   : > { %v1743_v8 = vpop.permute.xlu0 %1742  ;;  %1822 = vst.msk [vmem:[#allocation2 + $0xe8] sm:$0xff] %vm1792_vm9, %v1755_v10 }
 0x321   : > { %1816 = vst.msk [vmem:[#allocation2 + $0xb8] sm:$0xff] %vm1792_vm9, %v1743_v8 }
 0x325   : > { %v4000_v9 = vpop.f32.mrf.mxu2 }
 0x326   : > { %2004 = vst [vmem:[%s3928_s4 + $0x90] sm:$0xff] %v4000_v9  ;;  %v2073_v10 = vmul.f32 %v4000_v9, %v4000_v9 }
 0x327   : > { %v1564_v11 = vpop.permute.xlu1 %1563  ;;  %v1854_v12 = vld [vmem:[#allocation2 + $0xe8] sm:$0xff] }
 0x328   : > { %v1371_v16 = vpop.permute.xlu0 %1370  ;;  %v1848_v14 = vld [vmem:[#allocation2 + $0xb8] sm:$0xff]  ;;  %1976 = vmatmul.f32.gmra.mxu3 %v1854_v12 }
 0x329   : > { %1437 = vst.msk [vmem:[#allocation2 + $0xf0] sm:$0xff] %vm1406_vm7, %v1371_v16  ;;  %1958 = vmatmul.f32.gmra.mxu2 %v1848_v14 }
 0x32a   : > { %1630 = vst.msk [vmem:[#allocation2 + $0xf0] sm:$0xff] %vm1599_vm8, %v1564_v11 }
 0x32b   : > { %1823 = vst.msk [vmem:[#allocation2 + $0xf0] sm:$0xff] %vm1792_vm9, %v1757_v13 }
 0x32c   : > { %v4007_v15 = vpop.f32.mrf.mxu3 }
 0x32d   : > { %2010 = vst [vmem:[%s3928_s4 + $0xc0] sm:$0xff] %v4007_v15 }
 0x32f   : > { %v1373_v19 = vpop.permute.xlu1 %1372  ;;  %v1926_v17 = vpop.f32.mrf.mxu1 }
 0x330   : > { %v1179_v18 = vpop.permute.xlu0 %1178  ;;  %1998 = vst [vmem:[%s3928_s4 + $0x60] sm:$0xff] %v1926_v17  ;;  %v2067_v42 = vmul.f32 %v1926_v17, %v1926_v17 }
 0x331   : > { %1244 = vst.msk [vmem:[#allocation2 + $0xf8] sm:$0xff] %vm1212_vm6, %v1179_v18 }
 0x332   : > { %1438 = vst.msk [vmem:[#allocation2 + $0xf8] sm:$0xff] %vm1406_vm7, %v1373_v19  ;;  %v1855_v21 = vld [vmem:[#allocation2 + $0xf0] sm:$0xff] }
 0x333   : > { %1631 = vst.msk [vmem:[#allocation2 + $0xf8] sm:$0xff] %vm1599_vm8, %v1566_v20  ;;  %1979 = vmatmul.f32.gmra.mxu3 %v1855_v21 }
 0x335   : > { %v1908_v23 = vpop.f32.mrf.mxu0 }
 0x336   : > { %1992 = vst [vmem:[%s3928_s4 + $0x30] sm:$0xff] %v1908_v23  ;;  %v2023_v25 = vadd.f32 %v2022_v3, %v1908_v23  ;;  %v2061_v24 = vmul.f32 %v1908_v23, %v1908_v23 }
 0x338   : > { %v2092_v55 = vadd.f32 %v2091_v5, %v2061_v24  ;;  %v1759_v28 = vpop.permute.xlu0 %1758 }
 0x339   : > { %1824 = vst.msk [vmem:[#allocation2 + $0xf8] sm:$0xff] %vm1792_vm9, %v1759_v28 }
 0x340   : > { %v1856_v26 = vld [vmem:[#allocation2 + $0xf8] sm:$0xff] }
 0x341   : > { %1982 = vmatmul.f32.gmra.mxu3 %v1856_v26 }
 0x345   : > { %v1947_v58 = vpop.f32.mrf.mxu2 }
 0x346   : > { %2005 = vst [vmem:[%s3928_s4 + $0x98] sm:$0xff] %v1947_v58  ;;  %v2074_v11 = vmul.f32 %v1947_v58, %v1947_v58 }
 0x34c   : > { %v4018_v27 = vpop.f32.mrf.mxu3 }
 0x34d   : > { %2011 = vst [vmem:[%s3928_s4 + $0xc8] sm:$0xff] %v4018_v27 }
 0x34f   : > { %v1929_v31 = vpop.f32.mrf.mxu1 }
 0x350   : > { %1999 = vst [vmem:[%s3928_s4 + $0x68] sm:$0xff] %v1929_v31  ;;  %v2068_v41 = vmul.f32 %v1929_v31, %v1929_v31 }
 0x356   : > { %v1911_v61 = vpop.f32.mrf.mxu0 }
 0x357   : > { %1993 = vst [vmem:[%s3928_s4 + $0x38] sm:$0xff] %v1911_v61  ;;  %v2024_v35 = vadd.f32 %v2023_v25, %v1911_v61  ;;  %v2062_v1 = vmul.f32 %v1911_v61, %v1911_v61 }
 0x359   : > { %v2025_v51 = vadd.f32 %v2024_v35, %v3943_v22  ;;  %v2093_v38 = vadd.f32 %v2092_v55, %v2062_v1  ;;  %v2080_v1 = vmul.f32 %v4018_v27, %v4018_v27 }
 0x35b   : > { %v2026_v50 = vadd.f32 %v2025_v51, %v3954_v54  ;;  %v2094_v44 = vadd.f32 %v2093_v38, %v2063_v43 }
 0x35d   : > { %v2027_v36 = vadd.f32 %v2026_v50, %v3973_v45  ;;  %v2095_v32 = vadd.f32 %v2094_v44, %v2064_v47 }
 0x35f   : > { %v2096_v22 = vadd.f32 %v2095_v32, %v2065_v34  ;;  %v2028_v62 = vadd.f32 %v2027_v36, %v3988_v48 }
 0x361   : > { %v2029_v59 = vadd.f32 %v2028_v62, %v1926_v17  ;;  %v2097_v54 = vadd.f32 %v2096_v22, %v2066_v60 }
 0x363   : > { %v2030_v52 = vadd.f32 %v2029_v59, %v1929_v31  ;;  %v2098_v56 = vadd.f32 %v2097_v54, %v2067_v42  ;;  %v2079_v31 = vmul.f32 %v4007_v15, %v4007_v15 }
 0x365   : > { %v2099_v63 = vadd.f32 %v2098_v56, %v2068_v41  ;;  %v1950_v39 = vpop.f32.mrf.mxu2 }
 0x366   : > { %2006 = vst [vmem:[%s3928_s4 + $0xa0] sm:$0xff] %v1950_v39  ;;  %v2075_v16 = vmul.f32 %v1950_v39, %v1950_v39 }
 0x368   : > { %v1932_v45 = vpop.f32.mrf.mxu1 }
 0x369   : > { %2000 = vst [vmem:[%s3928_s4 + $0x70] sm:$0xff] %v1932_v45  ;;  %v2069_v46 = vmul.f32 %v1932_v45, %v1932_v45  ;;  %v2031_v37 = vadd.f32 %v2030_v52, %v1932_v45 }
 0x36b   : > { %v2100_v48 = vadd.f32 %v2099_v63, %v2069_v46 }
 0x36d   : > { %v1968_v33 = vpop.f32.mrf.mxu3 }
 0x36e   : > { %2012 = vst [vmem:[%s3928_s4 + $0xd0] sm:$0xff] %v1968_v33  ;;  %v2081_v38 = vmul.f32 %v1968_v33, %v1968_v33 }
 0x37d   : > { %v1953_v4 = vpop.f32.mrf.mxu2 }
 0x37e   : > { %2007 = vst [vmem:[%s3928_s4 + $0xa8] sm:$0xff] %v1953_v4  ;;  %v2076_v21 = vmul.f32 %v1953_v4, %v1953_v4 }
 0x380   : > { %v1935_v29 = vpop.f32.mrf.mxu1 }
 0x381   : > { %2001 = vst [vmem:[%s3928_s4 + $0x78] sm:$0xff] %v1935_v29  ;;  %v2032_v40 = vadd.f32 %v2031_v37, %v1935_v29  ;;  %v2070_v30 = vmul.f32 %v1935_v29, %v1935_v29 }
 0x383   : > { %v2033_v3 = vadd.f32 %v2032_v40, %v3964_v57  ;;  %v2101_v2 = vadd.f32 %v2100_v48, %v2070_v30 }
 0x385   : > { %v2034_v5 = vadd.f32 %v2033_v3, %v3984_v49  ;;  %v2102_v6 = vadd.f32 %v2101_v2, %v2071_v0  ;;  %v1971_v53 = vpop.f32.mrf.mxu3 }
 0x386   : > { %2013 = vst [vmem:[%s3928_s4 + $0xd8] sm:$0xff] %v1971_v53  ;;  %v2082_v36 = vmul.f32 %v1971_v53, %v1971_v53 }
 0x387   : > { %v2035_v8 = vadd.f32 %v2034_v5, %v4000_v9  ;;  %v2103_v13 = vadd.f32 %v2102_v6, %v2072_v7 }
 0x389   : > { %v2104_v12 = vadd.f32 %v2103_v13, %v2073_v10  ;;  %v2036_v57 = vadd.f32 %v2035_v8, %v1947_v58 }
 0x38b   : > { %v2037_v14 = vadd.f32 %v2036_v57, %v1950_v39  ;;  %v2105_v19 = vadd.f32 %v2104_v12, %v2074_v11 }
 0x38d   : > { %v2106_v17 = vadd.f32 %v2105_v19, %v2075_v16  ;;  %v2038_v20 = vadd.f32 %v2037_v14, %v1953_v4 }
 0x38f   : > { %v2107_v25 = vadd.f32 %v2106_v17, %v2076_v21 }
 0x395   : > { %v1956_v49 = vpop.f32.mrf.mxu2 }
 0x396   : > { %2008 = vst [vmem:[%s3928_s4 + $0xb0] sm:$0xff] %v1956_v49  ;;  %v2077_v23 = vmul.f32 %v1956_v49, %v1956_v49  ;;  %v2039_v24 = vadd.f32 %v2038_v20, %v1956_v49 }
 0x398   : > { %v2108_v28 = vadd.f32 %v2107_v25, %v2077_v23 }
 0x39c   : > { %v1974_v18 = vpop.f32.mrf.mxu3 }
 0x39d   : > { %2014 = vst [vmem:[%s3928_s4 + $0xe0] sm:$0xff] %v1974_v18 }
 0x3ab   : > { %v1977_v9 = vpop.f32.mrf.mxu3 }
 0x3ac   : > { %v1959_v55 = vpop.f32.mrf.mxu2  ;;  %2015 = vst [vmem:[%s3928_s4 + $0xe8] sm:$0xff] %v1977_v9  ;;  %v2084_v42 = vmul.f32 %v1977_v9, %v1977_v9 }
 0x3ad   : > { %2009 = vst [vmem:[%s3928_s4 + $0xb8] sm:$0xff] %v1959_v55  ;;  %v2040_v26 = vadd.f32 %v2039_v24, %v1959_v55  ;;  %v2078_v58 = vmul.f32 %v1959_v55, %v1959_v55 }
 0x3af   : > { %v2041_v61 = vadd.f32 %v2040_v26, %v4007_v15  ;;  %v2109_v35 = vadd.f32 %v2108_v28, %v2078_v58  ;;  %v2083_v15 = vmul.f32 %v1974_v18, %v1974_v18 }
 0x3b1   : > { %v2042_v43 = vadd.f32 %v2041_v61, %v4018_v27  ;;  %v2110_v51 = vadd.f32 %v2109_v35, %v2079_v31 }
 0x3b3   : > { %v2043_v47 = vadd.f32 %v2042_v43, %v1968_v33  ;;  %v2111_v50 = vadd.f32 %v2110_v51, %v2080_v1 }
 0x3b5   : > { %v2112_v44 = vadd.f32 %v2111_v50, %v2081_v38  ;;  %v2044_v32 = vadd.f32 %v2043_v47, %v1971_v53 }
 0x3b6   : > { %v1980_v34 = vpop.f32.mrf.mxu3 }
 0x3b7   : > { %2016 = vst [vmem:[%s3928_s4 + $0xf0] sm:$0xff] %v1980_v34  ;;  %v2113_v60 = vadd.f32 %v2112_v44, %v2082_v36  ;;  %v2045_v22 = vadd.f32 %v2044_v32, %v1974_v18  ;;  %v2085_v54 = vmul.f32 %v1980_v34, %v1980_v34 }
 0x3b9   : > { %v2114_v62 = vadd.f32 %v2113_v60, %v2083_v15  ;;  %v2046_v27 = vadd.f32 %v2045_v22, %v1977_v9 }
 0x3bb   : > { %v2115_v59 = vadd.f32 %v2114_v62, %v2084_v42  ;;  %v2047_v52 = vadd.f32 %v2046_v27, %v1980_v34 }
 0x3bd   : > { %v2116_v56 = vadd.f32 %v2115_v59, %v2085_v54 }
 0x3c4   : > { %v1983_v41 = vpop.f32.mrf.mxu3 }
 0x3c5   : > { %2017 = vst [vmem:[%s3928_s4 + $0xf8] sm:$0xff] %v1983_v41  ;;  %v2048_v63 = vadd.f32 %v2047_v52, %v1983_v41  ;;  %v2086_v39 = vmul.f32 %v1983_v41, %v1983_v41 }
 0x3c6   : > { %2594 = shalt.err (!%p2591_p3)
}
 0x3c7   : > { %s2672_s29 = smov 128   ;;  %v2049_v45 = vrot.slane %v2048_v63, 4  ;;  %v2117_v33 = vadd.f32 %v2116_v56, %v2086_v39  ;;  %s2262_s4 = sshll.u32 %s3917_s27, 1  ;;  %vm2124_vm10 = vcmask 1040384  }
 0x3c8   : > { %2513 = dma.vmem_to_hbm [thread:$0]  (%p2731_p5), %s2146_s9, 4096, %s2148_s5, %s2128_s10, %s2672_s29, %s2672_s29, %s2665_s30  }
 0x3c9   : > { %v2050_v46 = vadd.f32 %v2049_v45, %v2048_v63  ;;  %v2118_v4 = vrot.slane %v2117_v33, 4  ;;  %s2460_s28 = sshll.u32 %s2714_s16, 1  ;;  %s174_s30 = scalar_lea.vmem [#allocation5], %s2262_s4 }
 0x3ca   : > { %s2160_s8 = scalar_lea.hbm %s4116_s3, %s2460_s28  ;;  %s2162_s9 = sshll.u32 %s174_s30, 4  ;;  %s2163_s9 = int_to_ptr.vmem [resolvable:$true] %s2162_s9 }
 0x3cb   : > { %v2051_v37 = vrot.slane %v2050_v46, 2  ;;  %v2119_v29 = vadd.f32 %v2118_v4, %v2117_v33  ;;  %s2164_s5 = sshll.u32 %s2160_s8, 4  ;;  %s2133_s16 = scalar_lea.sflag [#allocation6], %s3917_s27  ;;  %s2165_s5 = int_to_ptr.hbm [resolvable:$true] %s2164_s5 }
 0x3cc   : > { %s2609_s10 = sshra.s32 %s2165_s5, 4  ;;  %s2615_s20 = scalar_lea.hbm %s4116_s3, 4  ;;  %s2610_s10 = int_to_ptr.hbm [resolvable:$true] %s2609_s10 }
 0x3cd   : > { %v2052_v48 = vadd.f32 %v2051_v37, %v2050_v46  ;;  %v2120_v40 = vrot.slane %v2119_v29, 2  ;;  %s2611_s11 = scalar_lea.hbm %s2610_s10, 2  ;;  %p2616_p9 = scmp.lt.s32.totalorder %s2610_s10, %s4116_s3 }
 0x3ce   : > { %p2612_p4 = scmp.ne.s32.totalorder %s2610_s10, %s2611_s11  ;;  %p2617_p10 = scmp.lt.s32.totalorder %s2615_s20, %s2611_s11 }
 0x3cf   : > { %v2053_v30 = vrot.slane %v2052_v48, 1  ;;  %v2121_v0 = vadd.f32 %v2120_v40, %v2119_v29 }
 0x3d0   : > { %p2613_p7 = pnand %p2612_p4, %p2731_p5  ;;  %p2618_p11 = por %p2617_p10, %p2616_p9 }
 0x3d1   : > { %v2122_v3 = vrot.slane %v2121_v0, 1  ;;  %v2054_v2 = vadd.f32 %v2053_v30, %v2052_v48 }
 0x3d2   : > { %p2614_p8 = pneg %p2613_p7 }
 0x3d3   : > { %v2123_v7 = vadd.f32 %v2122_v3, %v2121_v0 }
 0x3d4   : > { %p2619_p12 = pnand %p2618_p11, %p2614_p8 }
 0x3d5   : > { %v2125_v5 = vsel %vm2124_vm10, %v2054_v2, %v2123_v7 }
 0x3d6   : > { %2126 = vst [vmem:[%s174_s30] sm:$0x3] %v2125_v5 }
 0x3d7   : > { %2622 = shalt.err (!%p2619_p12)
}
 0x3d8   : > { %2514 = dma.vmem_to_hbm [thread:$0]  (%p2731_p5), %s2163_s9, 32, %s2165_s5, %s2133_s16  }
 0x3d9 PF: > { %p2524_p13 = scmp.ge.s32.totalorder %s2661_s15, 2  ;;  %s2176_s27 = sand.u32 1, %s2649_s12  }
 0x3da   : > { %s2177_s26 = scalar_lea.sflag [#allocation4], %s2176_s27 }
 0x3db   : > { %p2518_p0 = pnand %p2524_p13, %p2735_p6 }
 0x3dd   : > { %p2519_p1 = pneg %p2518_p0 }
 0x3df   : > { %2640 = dma.done.wait (%p2519_p1), %s2177_s26, 4096  }
 0x3e0   : > { %2642 = vsyncadd (%p2519_p1), %s2177_s26, 4294963200  ;;  %s2187_s29 = scalar_lea.sflag [#allocation6], %s2176_s27 }
 0x3e1   : > { %2644 = dma.done.wait (%p2519_p1), %s2187_s29, 32  }
 0x3e2   : > { %2646 = vsyncadd (%p2519_p1), %s2187_s29, 4294967264  ;;  %p17_p5 = scmp.ge.s32.totalorder %s2718_s18, 4   ;;  %s4206_s12 = smov %s2653_s13 }
 0x3e3   : > { %s4207_s13 = smov %s2657_s14  ;;  %s4208_s14 = smov %s2729_s21 }
 0x3e4   : > { %s4209_s15 = smov %s2718_s18  ;;  %19 = sbr.rel (!%p17_p5) target bundleno = 5 (0x5), region = 82 }
 0x3e9   :  { %2193 = vsyncpa [#allocation4], 1 }
 0x3ea   :  { %2195 = vsyncpa [#allocation4 + $0x1], 1 }
 0x3eb   :  { %2196 = vsyncpa [#allocation6], 1 }
 0x3ec   :  { %2198 = vsyncpa [#allocation6 + $0x1], 1 }

</bundles_post_ra>
